<compile_context>
chip_gen: v7x
topology: tpu7x:2x2x1
jax: 0.10.0
libtpu: 0.0.40
codegen_flags: <defaults>
</compile_context>

<pallas_src>
from functools import partial

import jax
import jax.numpy as jnp
from jax.experimental import pallas as pl
from jax.experimental.pallas import tpu as pltpu

LANE = 128


def _round_up(x, m):
    return ((x + m - 1) // m) * m


# ----------------------------------------------------------------------------- kernel
def text_encoder_kernel(x_ref, w_qkv_ref, b_qkv_ref, w_out_ref, b_out_ref,
                        w_add_ref, b_add_ref, qvec_ref, o_ref, heads_ref,
                        *, num_heads, head_pad):
    TB, S, Ep = x_ref.shape
    H = num_heads
    Dp = head_pad
    Qp = w_add_ref.shape[1]
    R = TB * S

    # Flatten block of sequences (Ep is a multiple of 128 -> layout-free collapse).
    x = x_ref[...].reshape(R, Ep)                                        # bf16 (R, Ep)

    # ---- nn.MultiheadAttention: fused QKV projection.
    # Head-major, 128-lane-aligned per-head column layout; 1/sqrt(Dh) pre-folded
    # into the q segments of weight and bias.
    qkv = jnp.dot(x, w_qkv_ref[...],
                  preferred_element_type=jnp.float32) + b_qkv_ref[...]   # (R, 3*H*Dp) f32
    qkv = qkv.astype(jnp.bfloat16)                                       # single bulk cast

    # ---- per-head scaled-dot-product attention, batched over TB ----
    for h in range(H):
        qh = qkv[:, h * Dp:(h + 1) * Dp].reshape(TB, S, Dp)
        kh = qkv[:, (H + h) * Dp:(H + h + 1) * Dp].reshape(TB, S, Dp)
        vh = qkv[:, (2 * H + h) * Dp:(2 * H + h + 1) * Dp].reshape(TB, S, Dp)

        s = jnp.einsum('bqd,bkd->bqk', qh, kh,
                       preferred_element_type=jnp.float32)               # (TB, S, S) f32
        s = s - jnp.max(s, axis=-1, keepdims=True)
        p = jnp.exp(s)
        p = p * pl.reciprocal(jnp.sum(p, axis=-1, keepdims=True), approx=True)
        oh = jnp.einsum('bqk,bkd->bqd', p.astype(jnp.bfloat16), vh,
                        preferred_element_type=jnp.float32)              # (TB, S, Dp) f32

        # "Concat": lane-aligned 128-wide slice of the heads scratch.
        heads_ref[:, h * Dp:(h + 1) * Dp] = oh.reshape(R, Dp).astype(jnp.bfloat16)

    # ---- single out-projection over the concatenated heads (K = H*Dp, well filled) ----
    mha = jnp.dot(heads_ref[...], w_out_ref[...],
                  preferred_element_type=jnp.float32) + b_out_ref[...]   # (R, Ep) f32

    # ---- AdditiveAttention: softmax_seq( tanh(mha W^T + b) . q ) weighted sum ----
    proj = jnp.tanh(jnp.dot(mha.astype(jnp.bfloat16), w_add_ref[...],
                            preferred_element_type=jnp.float32) + b_add_ref[...])  # (R, Qp)
    # Score = VPU multiply + lane reduction; softmax over S on the lane axis.
    sc = jnp.sum(proj.reshape(TB, S, Qp) * qvec_ref[...], axis=-1)       # (TB, S)
    sc = sc - jnp.max(sc, axis=-1, keepdims=True)
    wts = jnp.exp(sc)
    wts = wts * pl.reciprocal(jnp.sum(wts, axis=-1, keepdims=True), approx=True)

    pooled = jnp.sum(wts.reshape(TB, S, 1) * mha.reshape(TB, S, Ep), axis=1)   # (TB, Ep)
    o_ref[...] = pooled.astype(o_ref.dtype)                              # lane-dense store


# ------------------------------------------------------------------------ wrapper prep
def _tpu_defaults():
    kind = ""
    try:
        kind = jax.devices()[0].device_kind.lower()
    except Exception:
        pass
    if "v7" in kind:
        # 2 TensorCores, 64 MiB VMEM/TC: leave headroom, aim for >=2 grid steps.
        return dict(target_rows=256, vmem_limit=48 * 1024 * 1024, min_grid=2)
    if "v6" in kind:
        # 128 MiB VMEM, 256x256 MXU: bigger blocks amortize per-step overhead.
        return dict(target_rows=512, vmem_limit=96 * 1024 * 1024, min_grid=1)
    if "v5" in kind:
        # v5e: M multiples of 128 already fill the MXU; lift the 16 MiB scoped default.
        return dict(target_rows=256, vmem_limit=64 * 1024 * 1024, min_grid=1)
    return dict(target_rows=256, vmem_limit=64 * 1024 * 1024, min_grid=1)


def _pick_tb(B, S, target_rows, min_grid=1):
    """Batch block so TB*S ~ target_rows of MXU M dim; output block 8-sublane aligned."""
    tb = max(1, target_rows // max(1, S))
    if tb < B:
        tb = max(8, (tb // 8) * 8)
    tb = min(tb, B)
    if min_grid > 1 and tb >= B and B >= 8 * min_grid:
        # keep >= min_grid grid steps so both v7x TensorCores get work
        tb = max(8, (pl.cdiv(B, min_grid) // 8) * 8)
    return tb


def _prep_params(params, num_heads):
    """One-time weight prep: transpose, head-major lane padding, scale fold, bf16 cast."""
    E = params["embedding"].shape[1]
    H = num_heads
    Dh = E // H
    Q = params["w_add"].shape[0]
    Ep = _round_up(E, LANE)
    Dp = _round_up(Dh, LANE)
    Qp = _round_up(Q, LANE)
    scale = 1.0 / (Dh ** 0.5)

    w_in = params["w_in"].astype(jnp.float32)      # (3E, E) rows: [q; k; v]
    b_in = params["b_in"].astype(jnp.float32)      # (3E,)

    def pack_w(block, s):
        # block: (E, E) torch layout (out_features, in_features) -> (Ep, H*Dp)
        out = jnp.zeros((Ep, H * Dp), jnp.float32)
        wt = block.T * s                            # (E_in, E_out)
        for h in range(H):
            out = out.at[:E, h * Dp:h * Dp + Dh].set(wt[:, h * Dh:(h + 1) * Dh])
        return out

    def pack_b(vec, s):
        out = jnp.zeros((H * Dp,), jnp.float32)
        for h in range(H):
            out = out.at[h * Dp:h * Dp + Dh].set(vec[h * Dh:(h + 1) * Dh] * s)
        return out

    w_qkv = jnp.concatenate([pack_w(w_in[:E], scale),
                             pack_w(w_in[E:2 * E], 1.0),
                             pack_w(w_in[2 * E:], 1.0)], axis=1).astype(jnp.bfloat16)
    b_qkv = jnp.concatenate([pack_b(b_in[:E], scale),
                             pack_b(b_in[E:2 * E], 1.0),
                             pack_b(b_in[2 * E:], 1.0)])[None, :].astype(jnp.float32)

    w_out_t = params["w_out"].T.astype(jnp.float32)                   # (E, E)
    w_out_pad = jnp.zeros((H * Dp, Ep), jnp.float32)
    for h in range(H):
        w_out_pad = w_out_pad.at[h * Dp:h * Dp + Dh, :E].set(
            w_out_t[h * Dh:(h + 1) * Dh, :])
    w_out_pad = w_out_pad.astype(jnp.bfloat16)
    b_out = jnp.zeros((1, Ep), jnp.float32).at[0, :E].set(params["b_out"])

    w_add_pad = jnp.zeros((Ep, Qp), jnp.float32).at[:E, :Q].set(
        params["w_add"].T).astype(jnp.bfloat16)
    b_add = jnp.zeros((1, Qp), jnp.float32).at[0, :Q].set(params["b_add"])
    q_vec = jnp.zeros((1, Qp), jnp.float32).at[0, :Q].set(params["q_vec"])

    return dict(w_qkv=w_qkv, b_qkv=b_qkv, w_out=w_out_pad, b_out=b_out,
                w_add=w_add_pad, b_add=b_add, q_vec=q_vec, Ep=Ep, Dp=Dp, Qp=Qp)


# --------------------------------------------------------------------------- entry
def text_encoder(text, params, *, num_heads, tb=None):
    # Embedding gather is glue (plain JAX); the attention hot path is in the kernel.
    x = jnp.take(params["embedding"], text, axis=0)           # (B, S, E) f32
    B, S, E = x.shape
    H = num_heads
    prep = _prep_params(params, H)
    Ep, Dp, Qp = prep["Ep"], prep["Dp"], prep["Qp"]

    x_bf = x.astype(jnp.bfloat16)
    if Ep != E:
        x_bf = jnp.pad(x_bf, ((0, 0), (0, 0), (0, Ep - E)))   # zero lane padding

    cfg = _tpu_defaults()
    if tb is None:
        tb = _pick_tb(B, S, cfg["target_rows"], cfg["min_grid"])
    Bp = pl.cdiv(B, tb) * tb
    if Bp != B:
        x_bf = jnp.pad(x_bf, ((0, Bp - B), (0, 0), (0, 0)))
    grid_b = Bp // tb

    kernel = partial(text_encoder_kernel, num_heads=H, head_pad=Dp)

    R = Bp * S
    flops = (2 * R * (Ep * 3 * H * Dp + H * Dp * Ep + Ep * Qp + Qp + Ep)
             + 4 * Bp * H * S * S * Dp)
    transcendentals = Bp * H * S * S + Bp * S * Qp + Bp * S + Bp * (H * S + 1)
    bytes_accessed = (x_bf.size * 2
                      + (prep["w_qkv"].size + prep["w_out"].size + prep["w_add"].size) * 2
                      + (prep["b_qkv"].size + prep["b_out"].size
                         + prep["b_add"].size + prep["q_vec"].size) * 4
                      + Bp * Ep * 4)

    out = pl.pallas_call(
        kernel,
        out_shape=jax.ShapeDtypeStruct((Bp, Ep), jnp.float32),
        grid_spec=pltpu.PrefetchScalarGridSpec(
            num_scalar_prefetch=0,
            grid=(grid_b,),
            in_specs=[
                pl.BlockSpec((tb, S, Ep), lambda b: (b, 0, 0)),        # embedded text block
                pl.BlockSpec((Ep, 3 * H * Dp), lambda b: (0, 0)),      # fused QKV weight (padded, head-major)
                pl.BlockSpec((1, 3 * H * Dp), lambda b: (0, 0)),       # fused QKV bias (scaled q segment)
                pl.BlockSpec((H * Dp, Ep), lambda b: (0, 0)),          # out-proj weight^T (padded)
                pl.BlockSpec((1, Ep), lambda b: (0, 0)),               # out-proj bias
                pl.BlockSpec((Ep, Qp), lambda b: (0, 0)),              # additive linear weight^T
                pl.BlockSpec((1, Qp), lambda b: (0, 0)),               # additive linear bias
                pl.BlockSpec((1, Qp), lambda b: (0, 0)),               # additive query vector
            ],
            out_specs=pl.BlockSpec((tb, Ep), lambda b: (b, 0)),        # lane-dense output block
            scratch_shapes=[pltpu.VMEM((tb * S, H * Dp), jnp.bfloat16)],  # concat-of-heads
        ),
        compiler_params=pltpu.CompilerParams(
            dimension_semantics=("parallel",),
            vmem_limit_bytes=cfg["vmem_limit"],
        ),
        cost_estimate=pl.CostEstimate(
            flops=int(flops),
            transcendentals=int(transcendentals),
            bytes_accessed=int(bytes_accessed),
        ),
    )(x_bf, prep["w_qkv"], prep["b_qkv"], prep["w_out"], prep["b_out"],
      prep["w_add"], prep["b_add"], prep["q_vec"])
    return out[:B, :E]                                        # (B, E)


# ------------------------------------------------------------------------- reference
def reference(text, params, num_heads):
    x = jnp.take(params["embedding"], text, axis=0)
    B, S, E = x.shape
    Dh = E // num_heads
    qkv = x @ params["w_in"].T + params["b_in"]
    q, k, v = qkv[..., :E], qkv[..., E:2 * E], qkv[..., 2 * E:]

    def split(t):
        return t.reshape(B, S, num_heads, Dh).transpose(0, 2, 1, 3)

    q, k, v = split(q) / (Dh ** 0.5), split(k), split(v)
    s = jnp.einsum('bhsd,bhtd->bhst', q, k)
    p = jax.nn.softmax(s, axis=-1)
    a = jnp.einsum('bhst,bhtd->bhsd', p, v)
    a = a.transpose(0, 2, 1, 3).reshape(B, S, E)
    mha = a @ params["w_out"].T + params["b_out"]
    proj = jnp.tanh(mha @ params["w_add"].T + params["b_add"])
    sc = proj @ params["q_vec"]
    w = jax.nn.softmax(sc, axis=1)
    return jnp.einsum('bs,bse->be', w, mha)


if __name__ == "__main__":
    # Small shapes consistent with the module:
    #   vocab=50, word_embedding_dim=32, num_attention_heads=4,
    #   query_vector_dim=16, batch=2, seq_len=8
    V, E, H, Q = 50, 32, 4, 16
    B, S = 2, 8

    key = jax.random.PRNGKey(0)
    keys = jax.random.split(key, 9)

    emb = 0.02 * jax.random.normal(keys[0], (V, E), jnp.float32)
    emb = emb.at[0].set(0.0)                                  # padding_idx=0
    params = {
        "embedding": emb,
        "w_in": 0.05 * jax.random.normal(keys[1], (3 * E, E), jnp.float32),
        "b_in": 0.01 * jax.random.normal(keys[2], (3 * E,), jnp.float32),
        "w_out": 0.05 * jax.random.normal(keys[3], (E, E), jnp.float32),
        "b_out": 0.01 * jax.random.normal(keys[4], (E,), jnp.float32),
        "w_add": 0.05 * jax.random.normal(keys[5], (Q, E), jnp.float32),
        "b_add": 0.01 * jax.random.normal(keys[6], (Q,), jnp.float32),
        "q_vec": 0.1 * jax.random.normal(keys[7], (Q,), jnp.float32),
    }
    text = jax.random.randint(keys[8], (B, S), 1, V, dtype=jnp.int32)

    out = text_encoder(text, params, num_heads=H)
    out = jax.block_until_ready(out)

    ref = reference(text, params, H)
    assert out.shape == (B, E)
    # bf16 MXU operands + approximate reciprocals -> slightly looser tolerance vs f32 ref.
    assert jnp.allclose(out, ref, atol=2e-3, rtol=2e-2), "mismatch vs JAX reference"

    print("KERNEL_OK")
</pallas_src>

<mosaic_0001>
module attributes {stable_mosaic.version = 11 : i64} {
  func.func @text_encoder_kernel(%arg0: i32, %arg1: memref<2x8x128xbf16, #tpu.memory_space<vmem>>, %arg2: memref<128x1536xbf16, #tpu.memory_space<vmem>>, %arg3: memref<1x1536xf32, #tpu.memory_space<vmem>>, %arg4: memref<512x128xbf16, #tpu.memory_space<vmem>>, %arg5: memref<1x128xf32, #tpu.memory_space<vmem>>, %arg6: memref<128x128xbf16, #tpu.memory_space<vmem>>, %arg7: memref<1x128xf32, #tpu.memory_space<vmem>>, %arg8: memref<1x128xf32, #tpu.memory_space<vmem>>, %arg9: memref<2x128xf32, #tpu.memory_space<vmem>>, %arg10: memref<16x512xbf16, #tpu.memory_space<vmem>>) attributes {dimension_semantics = [#tpu.dimension_semantics<parallel>], iteration_bounds = array<i64: 1>, scalar_prefetch = 0 : i64, scratch_operands = 1 : i64, tpu.core_type = #tpu.core_type<tc>, window_params = [{transform_indices = @transform_0, window_bounds = array<i64: 2, 8, 128>}, {pipeline_mode = #tpu.pipeline_mode<synchronous>, transform_indices = @transform_1, window_bounds = array<i64: 128, 1536>}, {pipeline_mode = #tpu.pipeline_mode<synchronous>, transform_indices = @transform_2, window_bounds = array<i64: 1, 1536>}, {pipeline_mode = #tpu.pipeline_mode<synchronous>, transform_indices = @transform_3, window_bounds = array<i64: 512, 128>}, {pipeline_mode = #tpu.pipeline_mode<synchronous>, transform_indices = @transform_4, window_bounds = array<i64: 1, 128>}, {pipeline_mode = #tpu.pipeline_mode<synchronous>, transform_indices = @transform_5, window_bounds = array<i64: 128, 128>}, {pipeline_mode = #tpu.pipeline_mode<synchronous>, transform_indices = @transform_6, window_bounds = array<i64: 1, 128>}, {pipeline_mode = #tpu.pipeline_mode<synchronous>, transform_indices = @transform_7, window_bounds = array<i64: 1, 128>}, {transform_indices = @transform_8, window_bounds = array<i64: 2, 128>}]} {
    %c0 = arith.constant 0 : index
    %c0_0 = arith.constant 0 : index
    %c0_1 = arith.constant 0 : index
    %0 = vector.load %arg1[%c0, %c0_0, %c0_1] : memref<2x8x128xbf16, #tpu.memory_space<vmem>>, vector<2x8x128xbf16>
    %1 = vector.shape_cast %0 : vector<2x8x128xbf16> to vector<16x128xbf16>
    %c0_2 = arith.constant 0 : index
    %c0_3 = arith.constant 0 : index
    %2 = vector.load %arg2[%c0_2, %c0_3] : memref<128x1536xbf16, #tpu.memory_space<vmem>>, vector<128x1536xbf16>
    %cst = arith.constant dense<0.000000e+00> : vector<16x1536xf32>
    %3 = tpu.matmul %1, %2, %cst {dimension_numbers = #tpu.dot_dimension_numbers<[1], [0], [0], [1], [0, 0, 1, 1], [], []>} : vector<16x128xbf16>, vector<128x1536xbf16>, vector<16x1536xf32> -> vector<16x1536xf32>
    %c0_4 = arith.constant 0 : index
    %c0_5 = arith.constant 0 : index
    %4 = vector.load %arg3[%c0_4, %c0_5] : memref<1x1536xf32, #tpu.memory_space<vmem>>, vector<1x1536xf32>
    %5 = vector.broadcast %4 : vector<1x1536xf32> to vector<16x1536xf32>
    %6 = arith.addf %3, %5 : vector<16x1536xf32>
    %7 = arith.truncf %6 : vector<16x1536xf32> to vector<16x1536xbf16>
    %8 = vector.extract_strided_slice %7 {offsets = [0, 0], sizes = [16, 128], strides = [1, 1]} : vector<16x1536xbf16> to vector<16x128xbf16>
    %9 = vector.shape_cast %8 : vector<16x128xbf16> to vector<2x8x128xbf16>
    %10 = vector.extract_strided_slice %7 {offsets = [0, 512], sizes = [16, 128], strides = [1, 1]} : vector<16x1536xbf16> to vector<16x128xbf16>
    %11 = vector.shape_cast %10 : vector<16x128xbf16> to vector<2x8x128xbf16>
    %12 = vector.extract_strided_slice %7 {offsets = [0, 1024], sizes = [16, 128], strides = [1, 1]} : vector<16x1536xbf16> to vector<16x128xbf16>
    %13 = vector.shape_cast %12 : vector<16x128xbf16> to vector<2x8x128xbf16>
    "tpu.trace_start"() <{level = 10 : i32, message = "bqd,bkd->bqk"}> : () -> ()
    %cst_6 = arith.constant dense<0.000000e+00> : vector<2x8x8xf32>
    %14 = tpu.matmul %9, %11, %cst_6 {dimension_numbers = #tpu.dot_dimension_numbers<[2], [2], [1], [1], [0, 0, 0, 1, 1, 1], [0], [0]>} : vector<2x8x128xbf16>, vector<2x8x128xbf16>, vector<2x8x8xf32> -> vector<2x8x8xf32>
    "tpu.trace_stop"() : () -> ()
    %cst_7 = arith.constant dense<0xFF800000> : vector<2x8xf32>
    %15 = vector.multi_reduction <maximumf>, %14, %cst_7 [2] : vector<2x8x8xf32> to vector<2x8xf32>
    %16 = vector.shape_cast %15 : vector<2x8xf32> to vector<2x8x1xf32>
    %17 = vector.broadcast %16 : vector<2x8x1xf32> to vector<2x8x8xf32>
    %18 = arith.subf %14, %17 : vector<2x8x8xf32>
    %19 = math.exp %18 : vector<2x8x8xf32>
    %cst_8 = arith.constant dense<0.000000e+00> : vector<2x8xf32>
    %20 = vector.multi_reduction <add>, %19, %cst_8 [2] : vector<2x8x8xf32> to vector<2x8xf32>
    %21 = vector.shape_cast %20 : vector<2x8xf32> to vector<2x8x1xf32>
    %22 = tpu.reciprocal %21 {approx = true} : vector<2x8x1xf32> -> vector<2x8x1xf32>
    %23 = vector.broadcast %22 : vector<2x8x1xf32> to vector<2x8x8xf32>
    %24 = arith.mulf %19, %23 : vector<2x8x8xf32>
    %25 = arith.truncf %24 : vector<2x8x8xf32> to vector<2x8x8xbf16>
    "tpu.trace_start"() <{level = 10 : i32, message = "bqk,bkd->bqd"}> : () -> ()
    %cst_9 = arith.constant dense<0.000000e+00> : vector<2x8x128xf32>
    %26 = tpu.matmul %25, %13, %cst_9 {dimension_numbers = #tpu.dot_dimension_numbers<[2], [1], [1], [2], [0, 0, 0, 1, 1, 2], [0], [0]>} : vector<2x8x8xbf16>, vector<2x8x128xbf16>, vector<2x8x128xf32> -> vector<2x8x128xf32>
    "tpu.trace_stop"() : () -> ()
    %27 = vector.shape_cast %26 : vector<2x8x128xf32> to vector<16x128xf32>
    %28 = arith.truncf %27 : vector<16x128xf32> to vector<16x128xbf16>
    %c0_10 = arith.constant 0 : index
    %c0_11 = arith.constant 0 : index
    %29 = vector.load %arg10[%c0_10, %c0_11] : memref<16x512xbf16, #tpu.memory_space<vmem>>, vector<16x128xbf16>
    tpu.vector_store %arg10[%c0_10, %c0_11], %28 {strides = array<i32>} : memref<16x512xbf16, #tpu.memory_space<vmem>>, vector<16x128xbf16>,
    %30 = vector.extract_strided_slice %7 {offsets = [0, 128], sizes = [16, 128], strides = [1, 1]} : vector<16x1536xbf16> to vector<16x128xbf16>
    %31 = vector.shape_cast %30 : vector<16x128xbf16> to vector<2x8x128xbf16>
    %32 = vector.extract_strided_slice %7 {offsets = [0, 640], sizes = [16, 128], strides = [1, 1]} : vector<16x1536xbf16> to vector<16x128xbf16>
    %33 = vector.shape_cast %32 : vector<16x128xbf16> to vector<2x8x128xbf16>
    %34 = vector.extract_strided_slice %7 {offsets = [0, 1152], sizes = [16, 128], strides = [1, 1]} : vector<16x1536xbf16> to vector<16x128xbf16>
    %35 = vector.shape_cast %34 : vector<16x128xbf16> to vector<2x8x128xbf16>
    "tpu.trace_start"() <{level = 10 : i32, message = "bqd,bkd->bqk"}> : () -> ()
    %cst_12 = arith.constant dense<0.000000e+00> : vector<2x8x8xf32>
    %36 = tpu.matmul %31, %33, %cst_12 {dimension_numbers = #tpu.dot_dimension_numbers<[2], [2], [1], [1], [0, 0, 0, 1, 1, 1], [0], [0]>} : vector<2x8x128xbf16>, vector<2x8x128xbf16>, vector<2x8x8xf32> -> vector<2x8x8xf32>
    "tpu.trace_stop"() : () -> ()
    %cst_13 = arith.constant dense<0xFF800000> : vector<2x8xf32>
    %37 = vector.multi_reduction <maximumf>, %36, %cst_13 [2] : vector<2x8x8xf32> to vector<2x8xf32>
    %38 = vector.shape_cast %37 : vector<2x8xf32> to vector<2x8x1xf32>
    %39 = vector.broadcast %38 : vector<2x8x1xf32> to vector<2x8x8xf32>
    %40 = arith.subf %36, %39 : vector<2x8x8xf32>
    %41 = math.exp %40 : vector<2x8x8xf32>
    %cst_14 = arith.constant dense<0.000000e+00> : vector<2x8xf32>
    %42 = vector.multi_reduction <add>, %41, %cst_14 [2] : vector<2x8x8xf32> to vector<2x8xf32>
    %43 = vector.shape_cast %42 : vector<2x8xf32> to vector<2x8x1xf32>
    %44 = tpu.reciprocal %43 {approx = true} : vector<2x8x1xf32> -> vector<2x8x1xf32>
    %45 = vector.broadcast %44 : vector<2x8x1xf32> to vector<2x8x8xf32>
    %46 = arith.mulf %41, %45 : vector<2x8x8xf32>
    %47 = arith.truncf %46 : vector<2x8x8xf32> to vector<2x8x8xbf16>
    "tpu.trace_start"() <{level = 10 : i32, message = "bqk,bkd->bqd"}> : () -> ()
    %cst_15 = arith.constant dense<0.000000e+00> : vector<2x8x128xf32>
    %48 = tpu.matmul %47, %35, %cst_15 {dimension_numbers = #tpu.dot_dimension_numbers<[2], [1], [1], [2], [0, 0, 0, 1, 1, 2], [0], [0]>} : vector<2x8x8xbf16>, vector<2x8x128xbf16>, vector<2x8x128xf32> -> vector<2x8x128xf32>
    "tpu.trace_stop"() : () -> ()
    %49 = vector.shape_cast %48 : vector<2x8x128xf32> to vector<16x128xf32>
    %50 = arith.truncf %49 : vector<16x128xf32> to vector<16x128xbf16>
    %c0_16 = arith.constant 0 : index
    %c128 = arith.constant 128 : index
    %51 = vector.load %arg10[%c0_16, %c128] : memref<16x512xbf16, #tpu.memory_space<vmem>>, vector<16x128xbf16>
    tpu.vector_store %arg10[%c0_16, %c128], %50 {strides = array<i32>} : memref<16x512xbf16, #tpu.memory_space<vmem>>, vector<16x128xbf16>,
    %52 = vector.extract_strided_slice %7 {offsets = [0, 256], sizes = [16, 128], strides = [1, 1]} : vector<16x1536xbf16> to vector<16x128xbf16>
    %53 = vector.shape_cast %52 : vector<16x128xbf16> to vector<2x8x128xbf16>
    %54 = vector.extract_strided_slice %7 {offsets = [0, 768], sizes = [16, 128], strides = [1, 1]} : vector<16x1536xbf16> to vector<16x128xbf16>
    %55 = vector.shape_cast %54 : vector<16x128xbf16> to vector<2x8x128xbf16>
    %56 = vector.extract_strided_slice %7 {offsets = [0, 1280], sizes = [16, 128], strides = [1, 1]} : vector<16x1536xbf16> to vector<16x128xbf16>
    %57 = vector.shape_cast %56 : vector<16x128xbf16> to vector<2x8x128xbf16>
    "tpu.trace_start"() <{level = 10 : i32, message = "bqd,bkd->bqk"}> : () -> ()
    %cst_17 = arith.constant dense<0.000000e+00> : vector<2x8x8xf32>
    %58 = tpu.matmul %53, %55, %cst_17 {dimension_numbers = #tpu.dot_dimension_numbers<[2], [2], [1], [1], [0, 0, 0, 1, 1, 1], [0], [0]>} : vector<2x8x128xbf16>, vector<2x8x128xbf16>, vector<2x8x8xf32> -> vector<2x8x8xf32>
    "tpu.trace_stop"() : () -> ()
    %cst_18 = arith.constant dense<0xFF800000> : vector<2x8xf32>
    %59 = vector.multi_reduction <maximumf>, %58, %cst_18 [2] : vector<2x8x8xf32> to vector<2x8xf32>
    %60 = vector.shape_cast %59 : vector<2x8xf32> to vector<2x8x1xf32>
    %61 = vector.broadcast %60 : vector<2x8x1xf32> to vector<2x8x8xf32>
    %62 = arith.subf %58, %61 : vector<2x8x8xf32>
    %63 = math.exp %62 : vector<2x8x8xf32>
    %cst_19 = arith.constant dense<0.000000e+00> : vector<2x8xf32>
    %64 = vector.multi_reduction <add>, %63, %cst_19 [2] : vector<2x8x8xf32> to vector<2x8xf32>
    %65 = vector.shape_cast %64 : vector<2x8xf32> to vector<2x8x1xf32>
    %66 = tpu.reciprocal %65 {approx = true} : vector<2x8x1xf32> -> vector<2x8x1xf32>
    %67 = vector.broadcast %66 : vector<2x8x1xf32> to vector<2x8x8xf32>
    %68 = arith.mulf %63, %67 : vector<2x8x8xf32>
    %69 = arith.truncf %68 : vector<2x8x8xf32> to vector<2x8x8xbf16>
    "tpu.trace_start"() <{level = 10 : i32, message = "bqk,bkd->bqd"}> : () -> ()
    %cst_20 = arith.constant dense<0.000000e+00> : vector<2x8x128xf32>
    %70 = tpu.matmul %69, %57, %cst_20 {dimension_numbers = #tpu.dot_dimension_numbers<[2], [1], [1], [2], [0, 0, 0, 1, 1, 2], [0], [0]>} : vector<2x8x8xbf16>, vector<2x8x128xbf16>, vector<2x8x128xf32> -> vector<2x8x128xf32>
    "tpu.trace_stop"() : () -> ()
    %71 = vector.shape_cast %70 : vector<2x8x128xf32> to vector<16x128xf32>
    %72 = arith.truncf %71 : vector<16x128xf32> to vector<16x128xbf16>
    %c0_21 = arith.constant 0 : index
    %c256 = arith.constant 256 : index
    %73 = vector.load %arg10[%c0_21, %c256] : memref<16x512xbf16, #tpu.memory_space<vmem>>, vector<16x128xbf16>
    tpu.vector_store %arg10[%c0_21, %c256], %72 {strides = array<i32>} : memref<16x512xbf16, #tpu.memory_space<vmem>>, vector<16x128xbf16>,
    %74 = vector.extract_strided_slice %7 {offsets = [0, 384], sizes = [16, 128], strides = [1, 1]} : vector<16x1536xbf16> to vector<16x128xbf16>
    %75 = vector.shape_cast %74 : vector<16x128xbf16> to vector<2x8x128xbf16>
    %76 = vector.extract_strided_slice %7 {offsets = [0, 896], sizes = [16, 128], strides = [1, 1]} : vector<16x1536xbf16> to vector<16x128xbf16>
    %77 = vector.shape_cast %76 : vector<16x128xbf16> to vector<2x8x128xbf16>
    %78 = vector.extract_strided_slice %7 {offsets = [0, 1408], sizes = [16, 128], strides = [1, 1]} : vector<16x1536xbf16> to vector<16x128xbf16>
    %79 = vector.shape_cast %78 : vector<16x128xbf16> to vector<2x8x128xbf16>
    "tpu.trace_start"() <{level = 10 : i32, message = "bqd,bkd->bqk"}> : () -> ()
    %cst_22 = arith.constant dense<0.000000e+00> : vector<2x8x8xf32>
    %80 = tpu.matmul %75, %77, %cst_22 {dimension_numbers = #tpu.dot_dimension_numbers<[2], [2], [1], [1], [0, 0, 0, 1, 1, 1], [0], [0]>} : vector<2x8x128xbf16>, vector<2x8x128xbf16>, vector<2x8x8xf32> -> vector<2x8x8xf32>
    "tpu.trace_stop"() : () -> ()
    %cst_23 = arith.constant dense<0xFF800000> : vector<2x8xf32>
    %81 = vector.multi_reduction <maximumf>, %80, %cst_23 [2] : vector<2x8x8xf32> to vector<2x8xf32>
    %82 = vector.shape_cast %81 : vector<2x8xf32> to vector<2x8x1xf32>
    %83 = vector.broadcast %82 : vector<2x8x1xf32> to vector<2x8x8xf32>
    %84 = arith.subf %80, %83 : vector<2x8x8xf32>
    %85 = math.exp %84 : vector<2x8x8xf32>
    %cst_24 = arith.constant dense<0.000000e+00> : vector<2x8xf32>
    %86 = vector.multi_reduction <add>, %85, %cst_24 [2] : vector<2x8x8xf32> to vector<2x8xf32>
    %87 = vector.shape_cast %86 : vector<2x8xf32> to vector<2x8x1xf32>
    %88 = tpu.reciprocal %87 {approx = true} : vector<2x8x1xf32> -> vector<2x8x1xf32>
    %89 = vector.broadcast %88 : vector<2x8x1xf32> to vector<2x8x8xf32>
    %90 = arith.mulf %85, %89 : vector<2x8x8xf32>
    %91 = arith.truncf %90 : vector<2x8x8xf32> to vector<2x8x8xbf16>
    "tpu.trace_start"() <{level = 10 : i32, message = "bqk,bkd->bqd"}> : () -> ()
    %cst_25 = arith.constant dense<0.000000e+00> : vector<2x8x128xf32>
    %92 = tpu.matmul %91, %79, %cst_25 {dimension_numbers = #tpu.dot_dimension_numbers<[2], [1], [1], [2], [0, 0, 0, 1, 1, 2], [0], [0]>} : vector<2x8x8xbf16>, vector<2x8x128xbf16>, vector<2x8x128xf32> -> vector<2x8x128xf32>
    "tpu.trace_stop"() : () -> ()
    %93 = vector.shape_cast %92 : vector<2x8x128xf32> to vector<16x128xf32>
    %94 = arith.truncf %93 : vector<16x128xf32> to vector<16x128xbf16>
    %c0_26 = arith.constant 0 : index
    %c384 = arith.constant 384 : index
    %95 = vector.load %arg10[%c0_26, %c384] : memref<16x512xbf16, #tpu.memory_space<vmem>>, vector<16x128xbf16>
    tpu.vector_store %arg10[%c0_26, %c384], %94 {strides = array<i32>} : memref<16x512xbf16, #tpu.memory_space<vmem>>, vector<16x128xbf16>,
    %c0_27 = arith.constant 0 : index
    %c0_28 = arith.constant 0 : index
    %96 = vector.load %arg10[%c0_27, %c0_28] : memref<16x512xbf16, #tpu.memory_space<vmem>>, vector<16x512xbf16>
    %c0_29 = arith.constant 0 : index
    %c0_30 = arith.constant 0 : index
    %97 = vector.load %arg4[%c0_29, %c0_30] : memref<512x128xbf16, #tpu.memory_space<vmem>>, vector<512x128xbf16>
    %cst_31 = arith.constant dense<0.000000e+00> : vector<16x128xf32>
    %98 = tpu.matmul %96, %97, %cst_31 {dimension_numbers = #tpu.dot_dimension_numbers<[1], [0], [0], [1], [0, 0, 1, 1], [], []>} : vector<16x512xbf16>, vector<512x128xbf16>, vector<16x128xf32> -> vector<16x128xf32>
    %c0_32 = arith.constant 0 : index
    %c0_33 = arith.constant 0 : index
    %99 = vector.load %arg5[%c0_32, %c0_33] : memref<1x128xf32, #tpu.memory_space<vmem>>, vector<1x128xf32>
    %100 = vector.broadcast %99 : vector<1x128xf32> to vector<16x128xf32>
    %101 = arith.addf %98, %100 : vector<16x128xf32>
    %102 = arith.truncf %101 : vector<16x128xf32> to vector<16x128xbf16>
    %c0_34 = arith.constant 0 : index
    %c0_35 = arith.constant 0 : index
    %103 = vector.load %arg6[%c0_34, %c0_35] : memref<128x128xbf16, #tpu.memory_space<vmem>>, vector<128x128xbf16>
    %cst_36 = arith.constant dense<0.000000e+00> : vector<16x128xf32>
    %104 = tpu.matmul %102, %103, %cst_36 {dimension_numbers = #tpu.dot_dimension_numbers<[1], [0], [0], [1], [0, 0, 1, 1], [], []>} : vector<16x128xbf16>, vector<128x128xbf16>, vector<16x128xf32> -> vector<16x128xf32>
    %c0_37 = arith.constant 0 : index
    %c0_38 = arith.constant 0 : index
    %105 = vector.load %arg7[%c0_37, %c0_38] : memref<1x128xf32, #tpu.memory_space<vmem>>, vector<1x128xf32>
    %106 = vector.broadcast %105 : vector<1x128xf32> to vector<16x128xf32>
    %107 = arith.addf %104, %106 : vector<16x128xf32>
    %108 = math.tanh %107 : vector<16x128xf32>
    %109 = vector.shape_cast %108 : vector<16x128xf32> to vector<2x8x128xf32>
    %c0_39 = arith.constant 0 : index
    %c0_40 = arith.constant 0 : index
    %110 = vector.load %arg8[%c0_39, %c0_40] : memref<1x128xf32, #tpu.memory_space<vmem>>, vector<1x128xf32>
    %111 = vector.shape_cast %110 : vector<1x128xf32> to vector<1x1x128xf32>
    %112 = vector.broadcast %111 : vector<1x1x128xf32> to vector<2x8x128xf32>
    %113 = arith.mulf %109, %112 : vector<2x8x128xf32>
    %cst_41 = arith.constant dense<0.000000e+00> : vector<2x8xf32>
    %114 = vector.multi_reduction <add>, %113, %cst_41 [2] : vector<2x8x128xf32> to vector<2x8xf32>
    %cst_42 = arith.constant dense<0xFF800000> : vector<2xf32>
    %115 = vector.multi_reduction <maximumf>, %114, %cst_42 [1] : vector<2x8xf32> to vector<2xf32>
    %116 = vector.shape_cast %115 : vector<2xf32> to vector<2x1xf32>
    %117 = vector.broadcast %116 : vector<2x1xf32> to vector<2x8xf32>
    %118 = arith.subf %114, %117 : vector<2x8xf32>
    %119 = math.exp %118 : vector<2x8xf32>
    %cst_43 = arith.constant dense<0.000000e+00> : vector<2xf32>
    %120 = vector.multi_reduction <add>, %119, %cst_43 [1] : vector<2x8xf32> to vector<2xf32>
    %121 = vector.shape_cast %120 : vector<2xf32> to vector<2x1xf32>
    %122 = tpu.reciprocal %121 {approx = true} : vector<2x1xf32> -> vector<2x1xf32>
    %123 = vector.broadcast %122 : vector<2x1xf32> to vector<2x8xf32>
    %124 = arith.mulf %119, %123 : vector<2x8xf32>
    %125 = vector.shape_cast %124 : vector<2x8xf32> to vector<2x8x1xf32>
    %126 = vector.shape_cast %101 : vector<16x128xf32> to vector<2x8x128xf32>
    %127 = vector.broadcast %125 : vector<2x8x1xf32> to vector<2x8x128xf32>
    %128 = arith.mulf %127, %126 : vector<2x8x128xf32>
    %cst_44 = arith.constant dense<0.000000e+00> : vector<2x128xf32>
    %129 = vector.multi_reduction <add>, %128, %cst_44 [1] : vector<2x8x128xf32> to vector<2x128xf32>
    %c0_45 = arith.constant 0 : index
    %c0_46 = arith.constant 0 : index
    %130 = vector.load %arg9[%c0_45, %c0_46] : memref<2x128xf32, #tpu.memory_space<vmem>>, vector<2x128xf32>
    tpu.vector_store %arg9[%c0_45, %c0_46], %129 {strides = array<i32>} : memref<2x128xf32, #tpu.memory_space<vmem>>, vector<2x128xf32>,
    return
  }
  func.func @transform_0(%arg0: i32) -> (i32, i32, i32) {
    %c0_i32 = arith.constant 0 : i32
    %c0_i32_0 = arith.constant 0 : i32
    %c0_i32_1 = arith.constant 0 : i32
    return %arg0, %c0_i32, %c0_i32_0 : i32, i32, i32
  }
  func.func @transform_1(%arg0: i32) -> (i32, i32) {
    %c0_i32 = arith.constant 0 : i32
    %c0_i32_0 = arith.constant 0 : i32
    %c0_i32_1 = arith.constant 0 : i32
    return %c0_i32, %c0_i32_0 : i32, i32
  }
  func.func @transform_2(%arg0: i32) -> (i32, i32) {
    %c0_i32 = arith.constant 0 : i32
    %c0_i32_0 = arith.constant 0 : i32
    %c0_i32_1 = arith.constant 0 : i32
    return %c0_i32, %c0_i32_0 : i32, i32
  }
  func.func @transform_3(%arg0: i32) -> (i32, i32) {
    %c0_i32 = arith.constant 0 : i32
    %c0_i32_0 = arith.constant 0 : i32
    %c0_i32_1 = arith.constant 0 : i32
    return %c0_i32, %c0_i32_0 : i32, i32
  }
  func.func @transform_4(%arg0: i32) -> (i32, i32) {
    %c0_i32 = arith.constant 0 : i32
    %c0_i32_0 = arith.constant 0 : i32
    %c0_i32_1 = arith.constant 0 : i32
    return %c0_i32, %c0_i32_0 : i32, i32
  }
  func.func @transform_5(%arg0: i32) -> (i32, i32) {
    %c0_i32 = arith.constant 0 : i32
    %c0_i32_0 = arith.constant 0 : i32
    %c0_i32_1 = arith.constant 0 : i32
    return %c0_i32, %c0_i32_0 : i32, i32
  }
  func.func @transform_6(%arg0: i32) -> (i32, i32) {
    %c0_i32 = arith.constant 0 : i32
    %c0_i32_0 = arith.constant 0 : i32
    %c0_i32_1 = arith.constant 0 : i32
    return %c0_i32, %c0_i32_0 : i32, i32
  }
  func.func @transform_7(%arg0: i32) -> (i32, i32) {
    %c0_i32 = arith.constant 0 : i32
    %c0_i32_0 = arith.constant 0 : i32
    %c0_i32_1 = arith.constant 0 : i32
    return %c0_i32, %c0_i32_0 : i32, i32
  }
  func.func @transform_8(%arg0: i32) -> (i32, i32) {
    %c0_i32 = arith.constant 0 : i32
    %c0_i32_0 = arith.constant 0 : i32
    return %arg0, %c0_i32 : i32, i32
  }
}

</mosaic_0001>

<bundles_post_ra>
// kernel: tpu_custom_call.1
= control target key start
LH: loop header
LB: loop body
LE: loop exit
PB: predicated region body
PF: predicated region fallthrough
CT: control target
= control target key end

     0   :  { %13 = vsyncpa [#allocation4], 0  ;;  %s3783_s0 = inlined_call_operand.hbm [shape: bf16[2,8,128], index: 0, kind: input, shape index: {}]   ;;  %s3784_s1 = inlined_call_operand.hbm [shape: bf16[128,1536], index: 1, kind: input, shape index: {}]   ;;  %s3785_s2 = inlined_call_operand.hbm [shape: f32[1,1536], index: 2, kind: input, shape index: {}]   ;;  %s3786_s3 = inlined_call_operand.hbm [shape: bf16[512,128], index: 3, kind: input, shape index: {}]   ;;  %s3787_s4 = inlined_call_operand.hbm [shape: f32[1,128], index: 4, kind: input, shape index: {}]   ;;  %s3788_s5 = inlined_call_operand.hbm [shape: bf16[128,128], index: 5, kind: input, shape index: {}]   ;;  %s3789_s6 = inlined_call_operand.hbm [shape: f32[1,128], index: 6, kind: input, shape index: {}]   ;;  %s3790_s7 = inlined_call_operand.hbm [shape: f32[1,128], index: 7, kind: input, shape index: {}]   ;;  %s3791_s8 = inlined_call_operand.hbm [shape: f32[2,128], index: 8, kind: output, shape index: {}]  }
   0x1   :  { %14 = vsyncpa [#allocation7], 0 }
   0x2   :  { %15 = vsyncpa [#allocation10], 0 }
   0x3   :  { %16 = vsyncpa [#allocation13], 0 }
   0x4   :  { %17 = vsyncpa [#allocation16], 0 }
   0x5   :  { %18 = vsyncpa [#allocation5], 0  ;;  %s3368_s27 = smov [#allocation6]   ;;  %s3158_s9 = scalar_lea.hbm %s3784_s1, 12288 }
   0x6   :  { %s36_s28 = sshll.u32 %s3368_s27, 4  ;;  %p3159_p0 = scmp.ne.s32.totalorder %s3784_s1, %s3158_s9  ;;  %s37_s28 = int_to_ptr.vmem [resolvable:$true] %s36_s28 }
   0x7   :  { %p3162_p1 = scmp.lt.u32.totalorder %s3158_s9, %s3784_s1 }
   0x9   :  { %p3164_p2 = pnand %p3162_p1, %p3159_p0 }
   0xb   :  { %3167 = shalt.err (!%p3164_p2)
}
   0xc   :  { %s3168_s14 = scalar_lea.vmem %s37_s28, 12288  ;;  %p3173_p4 = scmp.lt.s32.totalorder %s37_s28, %s37_s28 }
   0xd   :  { %p3169_p3 = scmp.ne.s32.totalorder %s37_s28, %s3168_s14  ;;  %p3174_p5 = scmp.lt.s32.totalorder %s3168_s14, %s3168_s14 }
   0xf   :  { %p3175_p6 = por %p3174_p5, %p3173_p4 }
  0x11   :  { %p3176_p7 = pnand %p3175_p6, %p3169_p3 }
  0x13   :  { %3179 = shalt.err (!%p3176_p7)
}
  0x14   :  { %s3369_s15 = smov 768   ;;  %s3370_s16 = smov 48  }
  0x15   :  { %42 = dma.hbm_to_vmem [thread:$0]  %s3784_s1, 12288, %s37_s28, [#allocation7], %s3369_s15, %s3369_s15, %s3370_s16  }
  0x16   :  { %s3371_s19 = smov [#allocation9]   ;;  %s3372_s21 = smov [#allocation12]  }
  0x17   :  { %s58_s20 = sshll.u32 %s3371_s19, 4  ;;  %s80_s22 = sshll.u32 %s3372_s21, 4  ;;  %s59_s20 = int_to_ptr.vmem [resolvable:$true] %s58_s20  ;;  %s81_s22 = int_to_ptr.vmem [resolvable:$true] %s80_s22 }
  0x18   :  { %s3180_s25 = scalar_lea.hbm %s3786_s3, 4096 }
  0x19   :  { %p3181_p8 = scmp.ne.s32.totalorder %s3786_s3, %s3180_s25  ;;  %p3184_p9 = scmp.lt.u32.totalorder %s3180_s25, %s3786_s3 }
  0x1b   :  { %p3186_p10 = pnand %p3184_p9, %p3181_p8 }
  0x1d   :  { %3189 = shalt.err (!%p3186_p10)
}
  0x1e   :  { %s3190_s1 = scalar_lea.vmem %s59_s20, 4096  ;;  %p3195_p12 = scmp.lt.s32.totalorder %s59_s20, %s59_s20 }
  0x1f   :  { %p3191_p11 = scmp.ne.s32.totalorder %s59_s20, %s3190_s1  ;;  %p3196_p13 = scmp.lt.s32.totalorder %s3190_s1, %s3190_s1 }
  0x21   :  { %p3197_p0 = por %p3196_p13, %p3195_p12 }
  0x23   :  { %p3198_p1 = pnand %p3197_p0, %p3191_p11 }
  0x25   :  { %3201 = shalt.err (!%p3198_p1)
}
  0x26   :  { %s3373_s28 = smov 64   ;;  %s3374_s9 = smov 4  }
  0x27   :  { %64 = dma.hbm_to_vmem [thread:$0]  %s3786_s3, 4096, %s59_s20, [#allocation10], %s3373_s28, %s3373_s28, %s3374_s9  }
  0x28   :  { %s3202_s14 = scalar_lea.hbm %s3788_s5, 1024 }
  0x29   :  { %p3203_p2 = scmp.ne.s32.totalorder %s3788_s5, %s3202_s14  ;;  %p3206_p3 = scmp.lt.u32.totalorder %s3202_s14, %s3788_s5 }
  0x2b   :  { %p3208_p4 = pnand %p3206_p3, %p3203_p2 }
  0x2d   :  { %3211 = shalt.err (!%p3208_p4)
}
  0x2e   :  { %s3212_s19 = scalar_lea.vmem %s81_s22, 1024  ;;  %p3217_p6 = scmp.lt.s32.totalorder %s81_s22, %s81_s22 }
  0x2f   :  { %p3213_p5 = scmp.ne.s32.totalorder %s81_s22, %s3212_s19  ;;  %p3218_p7 = scmp.lt.s32.totalorder %s3212_s19, %s3212_s19 }
  0x31   :  { %p3219_p8 = por %p3218_p7, %p3217_p6 }
  0x33   :  { %p3220_p9 = pnand %p3219_p8, %p3213_p5 }
  0x35   :  { %3223 = shalt.err (!%p3220_p9)
}
  0x36   :  { %86 = dma.hbm_to_vmem [thread:$0]  %s3788_s5, 1024, %s81_s22, [#allocation13], %s3373_s28, %s3373_s28, %s3374_s9  }
  0x37   :  { %s3375_s21 = smov [#allocation3]   ;;  %s3376_s24 = smov [#allocation8]  }
  0x38   :  { %s24_s23 = sshll.u32 %s3375_s21, 4  ;;  %s49_s25 = sshll.u32 %s3376_s24, 4  ;;  %s25_s23 = int_to_ptr.vmem [resolvable:$true] %s24_s23  ;;  %s50_s25 = int_to_ptr.vmem [resolvable:$true] %s49_s25 }
  0x39   :  { %s3224_s29 = scalar_lea.hbm %s3783_s0, 128 }
  0x3a   :  { %p3225_p10 = scmp.ne.s32.totalorder %s3783_s0, %s3224_s29  ;;  %p3228_p11 = scmp.lt.u32.totalorder %s3224_s29, %s3783_s0 }
  0x3c   :  { %p3230_p12 = pnand %p3228_p11, %p3225_p10 }
  0x3e   :  { %3233 = shalt.err (!%p3230_p12)
}
  0x3f   :  { %s3234_s5 = scalar_lea.vmem %s25_s23, 128  ;;  %p3239_p0 = scmp.lt.s32.totalorder %s25_s23, %s25_s23 }
  0x40   :  { %p3235_p13 = scmp.ne.s32.totalorder %s25_s23, %s3234_s5  ;;  %p3240_p1 = scmp.lt.s32.totalorder %s3234_s5, %s3234_s5 }
  0x42   :  { %p3241_p2 = por %p3240_p1, %p3239_p0 }
  0x44   :  { %p3242_p3 = pnand %p3241_p2, %p3235_p13 }
  0x46   :  { %3245 = shalt.err (!%p3242_p3)
}
  0x47   :  { %30 = dma.hbm_to_vmem [thread:$0]  %s3783_s0, 128, %s25_s23, [#allocation4], %s3373_s28, %s3373_s28, %s3374_s9  }
  0x48   :  { %s3246_s15 = scalar_lea.hbm %s3785_s2, 192 }
  0x49   :  { %p3247_p4 = scmp.ne.s32.totalorder %s3785_s2, %s3246_s15  ;;  %p3250_p5 = scmp.lt.u32.totalorder %s3246_s15, %s3785_s2 }
  0x4b   :  { %p3252_p6 = pnand %p3250_p5, %p3247_p4 }
  0x4d   :  { %3255 = shalt.err (!%p3252_p6)
}
  0x4e   :  { %s3256_s3 = scalar_lea.vmem %s50_s25, 192  ;;  %p3261_p8 = scmp.lt.s32.totalorder %s50_s25, %s50_s25 }
  0x4f   :  { %p3257_p7 = scmp.ne.s32.totalorder %s50_s25, %s3256_s3  ;;  %p3262_p9 = scmp.lt.s32.totalorder %s3256_s3, %s3256_s3 }
  0x51   :  { %p3263_p10 = por %p3262_p9, %p3261_p8 }
  0x53   :  { %p3264_p11 = pnand %p3263_p10, %p3257_p7 }
  0x55   :  { %3267 = shalt.err (!%p3264_p11)
}
  0x56   :  { %52 = dma.hbm_to_vmem [thread:$0]  %s3785_s2, 192, %s50_s25, [#allocation7]  }
  0x57   :  { %s3377_s9 = smov [#allocation11]   ;;  %s3378_s21 = smov [#allocation14]  }
  0x58   :  { %s71_s20 = sshll.u32 %s3377_s9, 4  ;;  %s93_s23 = sshll.u32 %s3378_s21, 4  ;;  %s72_s20 = int_to_ptr.vmem [resolvable:$true] %s71_s20  ;;  %s94_s23 = int_to_ptr.vmem [resolvable:$true] %s93_s23 }
  0x59   :  { %s3268_s27 = scalar_lea.hbm %s3787_s4, 16 }
  0x5a   :  { %p3269_p12 = scmp.ne.s32.totalorder %s3787_s4, %s3268_s27  ;;  %p3272_p13 = scmp.lt.u32.totalorder %s3268_s27, %s3787_s4 }
  0x5c   :  { %p3274_p0 = pnand %p3272_p13, %p3269_p12 }
  0x5e   :  { %3277 = shalt.err (!%p3274_p0)
}
  0x5f   :  { %s3278_s2 = scalar_lea.vmem %s72_s20, 16  ;;  %s3282_s25 = scalar_lea.vmem %s72_s20, 32 }
  0x60   :  { %p3279_p1 = scmp.ne.s32.totalorder %s72_s20, %s3278_s2  ;;  %p3283_p2 = scmp.lt.s32.totalorder %s72_s20, %s72_s20 }
  0x61   :  { %p3284_p3 = scmp.lt.s32.totalorder %s3282_s25, %s3278_s2 }
  0x63   :  { %p3285_p4 = por %p3284_p3, %p3283_p2 }
  0x65   :  { %p3286_p5 = pnand %p3285_p4, %p3279_p1 }
  0x67   :  { %3289 = shalt.err (!%p3286_p5)
}
  0x68   :  { %74 = dma.hbm_to_vmem [thread:$0]  %s3787_s4, 16, %s72_s20, [#allocation10]  }
  0x69   :  { %s3290_s13 = scalar_lea.hbm %s3789_s6, 16 }
  0x6a   :  { %p3291_p6 = scmp.ne.s32.totalorder %s3789_s6, %s3290_s13  ;;  %p3294_p7 = scmp.lt.u32.totalorder %s3290_s13, %s3789_s6 }
  0x6c   :  { %p3296_p8 = pnand %p3294_p7, %p3291_p6 }
  0x6e   :  { %3299 = shalt.err (!%p3296_p8)
}
  0x6f   :  { %s3300_s18 = scalar_lea.vmem %s94_s23, 16  ;;  %s3304_s19 = scalar_lea.vmem %s94_s23, 32 }
  0x70   :  { %p3301_p9 = scmp.ne.s32.totalorder %s94_s23, %s3300_s18  ;;  %p3305_p10 = scmp.lt.s32.totalorder %s94_s23, %s94_s23 }
  0x71   :  { %p3306_p11 = scmp.lt.s32.totalorder %s3304_s19, %s3300_s18 }
  0x73   :  { %p3307_p12 = por %p3306_p11, %p3305_p10 }
  0x75   :  { %p3308_p13 = pnand %p3307_p12, %p3301_p9 }
  0x77   :  { %3311 = shalt.err (!%p3308_p13)
}
  0x78   :  { %96 = dma.hbm_to_vmem [thread:$0]  %s3789_s6, 16, %s94_s23, [#allocation13]  }
  0x79   :  { %s3379_s0 = smov [#allocation15]   ;;  %s3312_s21 = scalar_lea.hbm %s3790_s7, 16 }
  0x7a   :  { %s103_s28 = sshll.u32 %s3379_s0, 4  ;;  %p3313_p0 = scmp.ne.s32.totalorder %s3790_s7, %s3312_s21  ;;  %s104_s28 = int_to_ptr.vmem [resolvable:$true] %s103_s28 }
  0x7b   :  { %p3316_p1 = scmp.lt.u32.totalorder %s3312_s21, %s3790_s7 }
  0x7d   :  { %p3318_p2 = pnand %p3316_p1, %p3313_p0 }
  0x7f   :  { %3321 = shalt.err (!%p3318_p2)
}
  0x80   :  { %s3322_s30 = scalar_lea.vmem %s104_s28, 16  ;;  %s3326_s6 = scalar_lea.vmem %s104_s28, 32 }
  0x81   :  { %p3323_p3 = scmp.ne.s32.totalorder %s104_s28, %s3322_s30  ;;  %p3327_p4 = scmp.lt.s32.totalorder %s104_s28, %s104_s28 }
  0x82   :  { %p3328_p5 = scmp.lt.s32.totalorder %s3326_s6, %s3322_s30 }
  0x84   :  { %p3329_p6 = por %p3328_p5, %p3327_p4 }
  0x86   :  { %p3330_p7 = pnand %p3329_p6, %p3323_p3 }
  0x88   :  { %3333 = shalt.err (!%p3330_p7)
}
  0x89   :  { %106 = dma.hbm_to_vmem [thread:$0]  %s3790_s7, 16, %s104_s28, [#allocation16]  }
  0x8a   :  { %3356 = dma.done.wait [#allocation4], 128  }
  0x8b   :  { %3357 = vsyncadd [#allocation4], 4294967168 }
  0x8c   :  { %3358 = dma.done.wait [#allocation7], 12480  }
  0x8d   :  { %3359 = vsyncadd [#allocation7], 4294954816 }
  0x8e   :  { %3360 = dma.done.wait [#allocation10], 4112  }
  0x8f   :  { %3361 = vsyncadd [#allocation10], 4294963184 }
  0x90   :  { %3362 = dma.done.wait [#allocation13], 1040  }
  0x91   :  { %3363 = vsyncadd [#allocation13], 4294966256 }
  0x92   :  { %3364 = dma.done.wait [#allocation16], 16  }
  0x93   :  { %3365 = vsyncadd [#allocation16], 4294967280  ;;  %v3380_v0 = vmov 0   ;;  %v2931_v1 = vld [vmem:[#allocation6 + $0x4] ss:$48 sps:$4 sm:$0xff]   ;;  %v3538_v23 = vld [vmem:[#allocation3] sm:$0xff]  }
  0x94   :  { %812 = vmatprep.mubr.bf16.mxu0 %v3380_v0  ;;  %855 = vmatprep.mubr.bf16.mxu1 %v3380_v0  ;;  %v2933_v2 = vld [vmem:[#allocation6] ss:$48 sps:$4 sm:$0xff]   ;;  %v2934_v3 = vld [vmem:[#allocation6 + $0x64] ss:$48 sps:$4 sm:$0xff]   ;;  %v2980_v15 = vld [vmem:[#allocation6 + $0xc] ss:$48 sps:$4 sm:$0xff]  }
  0x95   :  { %2930 = vset.pattern.permute.xlu0 %v3380_v0  ;;  %2929 = vset.pattern.permute.xlu1 %v3380_v0  ;;  %v2936_v4 = vld [vmem:[#allocation6 + $0x60] ss:$48 sps:$4 sm:$0xff]   ;;  %v2937_v5 = vld [vmem:[#allocation6 + $0xc4] ss:$48 sps:$4 sm:$0xff]   ;;  %v2982_v16 = vld [vmem:[#allocation6 + $0x8] ss:$48 sps:$4 sm:$0xff]  }
  0x96   :  { %780 = vmatprep.subr.bf16.mxu0 %v2931_v1  ;;  %v2939_v6 = vld [vmem:[#allocation6 + $0xc0] ss:$48 sps:$4 sm:$0xff]   ;;  %v2940_v7 = vld [vmem:[#allocation6 + $0x124] ss:$48 sps:$4 sm:$0xff]   ;;  %v2983_v18 = vld [vmem:[#allocation6 + $0x6c] ss:$48 sps:$4 sm:$0xff]   ;;  %823 = vmatprep.subr.bf16.mxu1 %v2980_v15 }
  0x97   :  { %781 = vmatpush1.bf16.msra.mxu0 %v2933_v2  ;;  %v2942_v8 = vld [vmem:[#allocation6 + $0x120] ss:$48 sps:$4 sm:$0xff]   ;;  %v2943_v9 = vld [vmem:[#allocation6 + $0x184] ss:$48 sps:$4 sm:$0xff]   ;;  %824 = vmatpush1.bf16.msra.mxu1 %v2982_v16  ;;  %v2985_v19 = vld [vmem:[#allocation6 + $0x68] ss:$48 sps:$4 sm:$0xff]  }
  0x98   :  { %782 = vmatprep.subr.bf16.mxu0 %v2934_v3  ;;  %v2945_v10 = vld [vmem:[#allocation6 + $0x180] ss:$48 sps:$4 sm:$0xff]   ;;  %v2946_v11 = vld [vmem:[#allocation6 + $0x1e4] ss:$48 sps:$4 sm:$0xff]   ;;  %825 = vmatprep.subr.bf16.mxu1 %v2983_v18  ;;  %v2986_v21 = vld [vmem:[#allocation6 + $0xcc] ss:$48 sps:$4 sm:$0xff]  }
  0x99   :  { %v2948_v12 = vld [vmem:[#allocation6 + $0x1e0] ss:$48 sps:$4 sm:$0xff]   ;;  %v2949_v13 = vld [vmem:[#allocation6 + $0x244] ss:$48 sps:$4 sm:$0xff]   ;;  %v2988_v24 = vld [vmem:[#allocation6 + $0xc8] ss:$48 sps:$4 sm:$0xff]  }
  0x9a   :  { %v2951_v14 = vld [vmem:[#allocation6 + $0x240] ss:$48 sps:$4 sm:$0xff]   ;;  %v2952_v17 = vld [vmem:[#allocation6 + $0x2a4] ss:$48 sps:$4 sm:$0xff]   ;;  %v2989_v27 = vld [vmem:[#allocation6 + $0x12c] ss:$48 sps:$4 sm:$0xff]  }
  0x9b   :  { %783 = vmatpush1.bf16.msra.mxu0 %v2936_v4  ;;  %v2954_v20 = vld [vmem:[#allocation6 + $0x2a0] ss:$48 sps:$4 sm:$0xff]   ;;  %v2958_v22 = vld [vmem:[#allocation6 + $0x14] ss:$48 sps:$4 sm:$0xff]   ;;  %826 = vmatpush1.bf16.msra.mxu1 %v2985_v19  ;;  %v2991_v28 = vld [vmem:[#allocation6 + $0x128] ss:$48 sps:$4 sm:$0xff]  }
  0x9c   :  { %784 = vmatprep.subr.bf16.mxu0 %v2937_v5  ;;  %v2956_v25 = vld [vmem:[#allocation6 + $0x10] ss:$48 sps:$4 sm:$0xff]   ;;  %827 = vmatprep.subr.bf16.mxu1 %v2986_v21  ;;  %v2961_v26 = vld [vmem:[#allocation6 + $0x74] ss:$48 sps:$4 sm:$0xff]   ;;  %v2992_v30 = vld [vmem:[#allocation6 + $0x18c] ss:$48 sps:$4 sm:$0xff]  }
  0x9d   :  { %v2959_v29 = vld [vmem:[#allocation6 + $0x70] ss:$48 sps:$4 sm:$0xff]   ;;  %v2964_v31 = vld [vmem:[#allocation6 + $0xd4] ss:$48 sps:$4 sm:$0xff]   ;;  %v2994_v32 = vld [vmem:[#allocation6 + $0x188] ss:$48 sps:$4 sm:$0xff]  }
  0x9e   :  { %v2962_v33 = vld [vmem:[#allocation6 + $0xd0] ss:$48 sps:$4 sm:$0xff]   ;;  %v2995_v34 = vld [vmem:[#allocation6 + $0x1ec] ss:$48 sps:$4 sm:$0xff]   ;;  %v2967_v35 = vld [vmem:[#allocation6 + $0x134] ss:$48 sps:$4 sm:$0xff]  }
  0x9f   :  { %785 = vmatpush1.bf16.msra.mxu0 %v2939_v6  ;;  %828 = vmatpush1.bf16.msra.mxu1 %v2988_v24  ;;  %v2997_v36 = vld [vmem:[#allocation6 + $0x1e8] ss:$48 sps:$4 sm:$0xff]   ;;  %v2965_v37 = vld [vmem:[#allocation6 + $0x130] ss:$48 sps:$4 sm:$0xff]   ;;  %v2998_v38 = vld [vmem:[#allocation6 + $0x24c] ss:$48 sps:$4 sm:$0xff]  }
  0xa0   :  { %786 = vmatprep.subr.bf16.mxu0 %v2940_v7  ;;  %829 = vmatprep.subr.bf16.mxu1 %v2989_v27  ;;  %v2970_v39 = vld [vmem:[#allocation6 + $0x194] ss:$48 sps:$4 sm:$0xff]   ;;  %v3000_v40 = vld [vmem:[#allocation6 + $0x248] ss:$48 sps:$4 sm:$0xff]   ;;  %v2968_v41 = vld [vmem:[#allocation6 + $0x190] ss:$48 sps:$4 sm:$0xff]  }
  0xa1   :  { %v3001_v42 = vld [vmem:[#allocation6 + $0x2ac] ss:$48 sps:$4 sm:$0xff]   ;;  %v2973_v43 = vld [vmem:[#allocation6 + $0x1f4] ss:$48 sps:$4 sm:$0xff]   ;;  %v3003_v44 = vld [vmem:[#allocation6 + $0x2a8] ss:$48 sps:$4 sm:$0xff]  }
  0xa2   :  { %v2971_v45 = vld [vmem:[#allocation6 + $0x1f0] ss:$48 sps:$4 sm:$0xff]   ;;  %v3006_v46 = vld [vmem:[#allocation6 + $0x1c] ss:$48 sps:$4 sm:$0xff]   ;;  %v2976_v47 = vld [vmem:[#allocation6 + $0x254] ss:$48 sps:$4 sm:$0xff]  }
  0xa3   :  { %787 = vmatpush1.bf16.msra.mxu0 %v2942_v8  ;;  %830 = vmatpush1.bf16.msra.mxu1 %v2991_v28  ;;  %v3004_v48 = vld [vmem:[#allocation6 + $0x18] ss:$48 sps:$4 sm:$0xff]   ;;  %v2974_v49 = vld [vmem:[#allocation6 + $0x250] ss:$48 sps:$4 sm:$0xff]   ;;  %v3009_v50 = vld [vmem:[#allocation6 + $0x7c] ss:$48 sps:$4 sm:$0xff]  }
  0xa4   :  { %788 = vmatprep.subr.bf16.mxu0 %v2943_v9  ;;  %831 = vmatprep.subr.bf16.mxu1 %v2992_v30  ;;  %v2979_v51 = vld [vmem:[#allocation6 + $0x2b4] ss:$48 sps:$4 sm:$0xff]   ;;  %v3007_v52 = vld [vmem:[#allocation6 + $0x78] ss:$48 sps:$4 sm:$0xff]   ;;  %v2977_v53 = vld [vmem:[#allocation6 + $0x2b0] ss:$48 sps:$4 sm:$0xff]  }
  0xa5   :  { %v3012_v54 = vld [vmem:[#allocation6 + $0xdc] ss:$48 sps:$4 sm:$0xff]   ;;  %v3010_v55 = vld [vmem:[#allocation6 + $0xd8] ss:$48 sps:$4 sm:$0xff]   ;;  %v3033_v5 = vld [vmem:[#allocation6 + $0x24] ss:$48 sps:$4 sm:$0xff]  }
  0xa6   :  { %v3015_v56 = vld [vmem:[#allocation6 + $0x13c] ss:$48 sps:$4 sm:$0xff]   ;;  %v3013_v57 = vld [vmem:[#allocation6 + $0x138] ss:$48 sps:$4 sm:$0xff]   ;;  %v3031_v6 = vld [vmem:[#allocation6 + $0x20] ss:$48 sps:$4 sm:$0xff]  }
  0xa7   :  { %789 = vmatpush1.bf16.msra.mxu0 %v2945_v10  ;;  %832 = vmatpush1.bf16.msra.mxu1 %v2994_v32  ;;  %v3018_v58 = vld [vmem:[#allocation6 + $0x19c] ss:$48 sps:$4 sm:$0xff]   ;;  %v3016_v59 = vld [vmem:[#allocation6 + $0x198] ss:$48 sps:$4 sm:$0xff]   ;;  %v3039_v9 = vld [vmem:[#allocation6 + $0x84] ss:$48 sps:$4 sm:$0xff]  }
  0xa8   :  { %790 = vmatprep.subr.bf16.mxu0 %v2946_v11  ;;  %833 = vmatprep.subr.bf16.mxu1 %v2995_v34  ;;  %v3021_v60 = vld [vmem:[#allocation6 + $0x1fc] ss:$48 sps:$4 sm:$0xff]   ;;  %v3019_v61 = vld [vmem:[#allocation6 + $0x1f8] ss:$48 sps:$4 sm:$0xff]   ;;  %v3037_v10 = vld [vmem:[#allocation6 + $0x80] ss:$48 sps:$4 sm:$0xff]  }
  0xa9   :  { %v3024_v62 = vld [vmem:[#allocation6 + $0x25c] ss:$48 sps:$4 sm:$0xff]   ;;  %v3022_v63 = vld [vmem:[#allocation6 + $0x258] ss:$48 sps:$4 sm:$0xff]   ;;  %v3051_v16 = vld [vmem:[#allocation6 + $0x144] ss:$48 sps:$4 sm:$0xff]  }
  0xaa   :  { %v3027_v1 = vld [vmem:[#allocation6 + $0x2bc] ss:$48 sps:$4 sm:$0xff]   ;;  %v3025_v2 = vld [vmem:[#allocation6 + $0x2b8] ss:$48 sps:$4 sm:$0xff]   ;;  %v3057_v19 = vld [vmem:[#allocation6 + $0x1a4] ss:$48 sps:$4 sm:$0xff]  }
  0xab   :  { %791 = vmatpush1.bf16.msra.mxu0 %v2948_v12  ;;  %834 = vmatpush1.bf16.msra.mxu1 %v2997_v36  ;;  %v3030_v3 = vld [vmem:[#allocation6 + $0x2c] ss:$48 sps:$4 sm:$0xff]   ;;  %v3028_v4 = vld [vmem:[#allocation6 + $0x28] ss:$48 sps:$4 sm:$0xff]   ;;  %v3055_v21 = vld [vmem:[#allocation6 + $0x1a0] ss:$48 sps:$4 sm:$0xff]   ;;  %v234_v36 = vlaneseq }
  0xac   :  { %792 = vmatprep.subr.bf16.mxu0 %v2949_v13  ;;  %835 = vmatprep.subr.bf16.mxu1 %v2998_v38  ;;  %v3036_v7 = vld [vmem:[#allocation6 + $0x8c] ss:$48 sps:$4 sm:$0xff]   ;;  %v3034_v8 = vld [vmem:[#allocation6 + $0x88] ss:$48 sps:$4 sm:$0xff]   ;;  %v3043_v13 = vld [vmem:[#allocation6 + $0xe0] ss:$48 sps:$4 sm:$0xff]  }
  0xad   :  { %v3042_v11 = vld [vmem:[#allocation6 + $0xec] ss:$48 sps:$4 sm:$0xff]   ;;  %v3040_v12 = vld [vmem:[#allocation6 + $0xe8] ss:$48 sps:$4 sm:$0xff]   ;;  %v3063_v24 = vld [vmem:[#allocation6 + $0x204] ss:$48 sps:$4 sm:$0xff]  }
  0xae   :  { %v3048_v15 = vld [vmem:[#allocation6 + $0x14c] ss:$48 sps:$4 sm:$0xff]   ;;  %v3069_v28 = vld [vmem:[#allocation6 + $0x264] ss:$48 sps:$4 sm:$0xff]   ;;  %v3067_v30 = vld [vmem:[#allocation6 + $0x260] ss:$48 sps:$4 sm:$0xff]  }
  0xaf   :  { %793 = vmatpush1.bf16.msra.mxu0 %v2951_v14  ;;  %836 = vmatpush1.bf16.msra.mxu1 %v3000_v40  ;;  %v3045_v14 = vld [vmem:[#allocation6 + $0xe4] ss:$48 sps:$4 sm:$0xff]   ;;  %v3054_v18 = vld [vmem:[#allocation6 + $0x1ac] ss:$48 sps:$4 sm:$0xff]   ;;  %v3073_v34 = vld [vmem:[#allocation6 + $0x2c0] ss:$48 sps:$4 sm:$0xff]  }
  0xb0   :  { %794 = vmatprep.subr.bf16.mxu0 %v2952_v17  ;;  %837 = vmatprep.subr.bf16.mxu1 %v3001_v42  ;;  %v3049_v17 = vld [vmem:[#allocation6 + $0x140] ss:$48 sps:$4 sm:$0xff]   ;;  %v3066_v27 = vld [vmem:[#allocation6 + $0x26c] ss:$48 sps:$4 sm:$0xff]   ;;  %v3075_v32 = vld [vmem:[#allocation6 + $0x2c4] ss:$48 sps:$4 sm:$0xff]  }
  0xb1   :  { %vm3382_vm0 = vmmov 0   ;;  %vm1177_vm1 = vcmask 1043456   ;;  %vm1149_vm2 = vcmask 64512   ;;  %vm2409_vm3 = vcmask 1041409   ;;  %s3383_s7 = smov [#allocation17]  }
  0xb2   :  { %vm2412_vm4 = vcmask 58368   ;;  %s2503_s10 = sshll.u32 %s3383_s7, 4  ;;  %s2504_s10 = int_to_ptr.vmem [resolvable:$true] %s2503_s10 }
  0xb3   :  { %795 = vmatpush1.bf16.msra.mxu0 %v2954_v20  ;;  %838 = vmatpush1.bf16.msra.mxu1 %v3003_v44  ;;  %v3052_v20 = vld [vmem:[#allocation6 + $0x1a8] ss:$48 sps:$4 sm:$0xff]   ;;  %s3334_s2 = scalar_lea.vmem %s2504_s10, 32  ;;  %p3339_p9 = scmp.lt.s32.totalorder %s2504_s10, %s2504_s10 }
  0xb4   :  { %866 = vmatprep.subr.bf16.mxu0 %v2958_v22  ;;  %909 = vmatprep.subr.bf16.mxu1 %v3006_v46  ;;  %v3060_v22 = vld [vmem:[#allocation6 + $0x20c] ss:$48 sps:$4 sm:$0xff]   ;;  %p3335_p8 = scmp.ne.s32.totalorder %s2504_s10, %s3334_s2  ;;  %p3340_p10 = scmp.lt.s32.totalorder %s3334_s2, %s3334_s2 }
  0xb6   :  { %813 = vmatmul.mubr.bf16.vlgmr.msra.gmra.mrb[0].mxu0 %v3538_v23  ;;  %856 = vmatmul.mubr.bf16.vlgmr.msra.gmra.mrb[0].mxu1 %v3538_v23  ;;  %p3341_p11 = por %p3340_p10, %p3339_p9 }
  0xb7   :  { %867 = vmatpush1.bf16.msra.mxu0 %v2956_v25  ;;  %898 = vmatprep.mubr.bf16.mxu0 %v3380_v0  ;;  %v3058_v25 = vld [vmem:[#allocation6 + $0x208] ss:$48 sps:$4 sm:$0xff]  }
  0xb8   :  { %868 = vmatprep.subr.bf16.mxu0 %v2961_v26  ;;  %910 = vmatpush1.bf16.msra.mxu1 %v3004_v48  ;;  %v3061_v26 = vld [vmem:[#allocation6 + $0x200] ss:$48 sps:$4 sm:$0xff]   ;;  %p3342_p12 = pnand %p3341_p11, %p3335_p8 }
  0xb9   :  { %941 = vmatprep.mubr.bf16.mxu1 %v3380_v0  ;;  %911 = vmatprep.subr.bf16.mxu1 %v3009_v50 }
  0xbb   :  { %869 = vmatpush1.bf16.msra.mxu0 %v2959_v29  ;;  %v3064_v29 = vld [vmem:[#allocation6 + $0x268] ss:$48 sps:$4 sm:$0xff]  }
  0xbc   :  { %870 = vmatprep.subr.bf16.mxu0 %v2964_v31  ;;  %912 = vmatpush1.bf16.msra.mxu1 %v3007_v52  ;;  %v3072_v31 = vld [vmem:[#allocation6 + $0x2cc] ss:$48 sps:$4 sm:$0xff]  }
  0xbd   :  { %913 = vmatprep.subr.bf16.mxu1 %v3012_v54 }
  0xbf   :  { %871 = vmatpush1.bf16.msra.mxu0 %v2962_v33  ;;  %v3070_v33 = vld [vmem:[#allocation6 + $0x2c8] ss:$48 sps:$4 sm:$0xff]  }
  0xc0   :  { %872 = vmatprep.subr.bf16.mxu0 %v2967_v35  ;;  %914 = vmatpush1.bf16.msra.mxu1 %v3010_v55  ;;  %v3381_v35 = vmov 0.0  }
  0xc1   :  { %915 = vmatprep.subr.bf16.mxu1 %v3015_v56 }
  0xc3   :  { %873 = vmatpush1.bf16.msra.mxu0 %v2965_v37  ;;  %v3557_v37 = vshrl.u32 %v234_v36, 7 }
  0xc4   :  { %874 = vmatprep.subr.bf16.mxu0 %v2970_v39  ;;  %916 = vmatpush1.bf16.msra.mxu1 %v3013_v57 }
  0xc5   :  { %917 = vmatprep.subr.bf16.mxu1 %v3018_v58  ;;  %v3560_v38 = vsub.s32 1, %v3557_v37  ;;  %v248_v46 = vsub.s32 3, %v3557_v37  ;;  %v3584_v58 = vsub.s32 0, %v3557_v37 }
  0xc7   :  { %875 = vmatpush1.bf16.msra.mxu0 %v2968_v41 }
  0xc8   :  { %876 = vmatprep.subr.bf16.mxu0 %v2973_v43  ;;  %918 = vmatpush1.bf16.msra.mxu1 %v3016_v59 }
  0xc9   :  { %919 = vmatprep.subr.bf16.mxu1 %v3021_v60 }
  0xcb   :  { %877 = vmatpush1.bf16.msra.mxu0 %v2971_v45  ;;  %v244_v45 = vsub.s32 2, %v3557_v37 }
  0xcc   :  { %878 = vmatprep.subr.bf16.mxu0 %v2976_v47  ;;  %920 = vmatpush1.bf16.msra.mxu1 %v3019_v61 }
  0xcd   :  { %921 = vmatprep.subr.bf16.mxu1 %v3024_v62 }
  0xcf   :  { %879 = vmatpush1.bf16.msra.mxu0 %v2974_v49 }
  0xd0   :  { %880 = vmatprep.subr.bf16.mxu0 %v2979_v51  ;;  %922 = vmatpush1.bf16.msra.mxu1 %v3022_v63  ;;  %v252_v51 = vsub.s32 4, %v3557_v37 }
  0xd1   :  { %923 = vmatprep.subr.bf16.mxu1 %v3027_v1 }
  0xd3   :  { %881 = vmatpush1.bf16.msra.mxu0 %v2977_v53  ;;  %v256_v53 = vsub.s32 5, %v3557_v37 }
  0xd4   :  { %924 = vmatpush1.bf16.msra.mxu1 %v3025_v2  ;;  %952 = vmatprep.subr.bf16.mxu0 %v3033_v5 }
  0xd5   :  { %995 = vmatprep.subr.bf16.mxu1 %v3030_v3 }
  0xd6   :  { %899 = vmatmul.mubr.bf16.vlgmr.msra.gmra.mrb[4].mxu0 %v3538_v23 }
  0xd7   :  { %984 = vmatprep.mubr.bf16.mxu0 %v3380_v0  ;;  %942 = vmatmul.mubr.bf16.vlgmr.msra.gmra.mrb[4].mxu1 %v3538_v23 }
  0xd8   :  { %996 = vmatpush1.bf16.msra.mxu1 %v3028_v4  ;;  %1027 = vmatprep.mubr.bf16.mxu1 %v3380_v0  ;;  %v3046_v0 = vld [vmem:[#allocation6 + $0x148] ss:$48 sps:$4 sm:$0xff]  }
  0xd9   :  { %953 = vmatpush1.bf16.msra.mxu0 %v3031_v6  ;;  %997 = vmatprep.subr.bf16.mxu1 %v3036_v7 }
  0xda   :  { %954 = vmatprep.subr.bf16.mxu0 %v3039_v9 }
  0xdc   :  { %998 = vmatpush1.bf16.msra.mxu1 %v3034_v8 }
  0xdd   :  { %955 = vmatpush1.bf16.msra.mxu0 %v3037_v10  ;;  %999 = vmatprep.subr.bf16.mxu1 %v3042_v11 }
  0xde   :  { %956 = vmatprep.subr.bf16.mxu0 %v3045_v14 }
  0xe0   :  { %1000 = vmatpush1.bf16.msra.mxu1 %v3040_v12 }
  0xe1   :  { %957 = vmatpush1.bf16.msra.mxu0 %v3043_v13  ;;  %1001 = vmatprep.subr.bf16.mxu1 %v3048_v15  ;;  %v260_v15 = vsub.s32 6, %v3557_v37 }
  0xe2   :  { %958 = vmatprep.subr.bf16.mxu0 %v3051_v16 }
  0xe4   :  { %1002 = vmatpush1.bf16.msra.mxu1 %v3046_v0  ;;  %v264_v0 = vsub.s32 7, %v3557_v37 }
  0xe5   :  { %959 = vmatpush1.bf16.msra.mxu0 %v3049_v17  ;;  %1003 = vmatprep.subr.bf16.mxu1 %v3054_v18 }
  0xe6   :  { %960 = vmatprep.subr.bf16.mxu0 %v3057_v19 }
  0xe8   :  { %1004 = vmatpush1.bf16.msra.mxu1 %v3052_v20 }
  0xe9   :  { %961 = vmatpush1.bf16.msra.mxu0 %v3055_v21  ;;  %1005 = vmatprep.subr.bf16.mxu1 %v3060_v22 }
  0xea   :  { %962 = vmatprep.subr.bf16.mxu0 %v3063_v24 }
  0xec   :  { %1006 = vmatpush1.bf16.msra.mxu1 %v3058_v25  ;;  %v231_v25 = vld [vmem:[#allocation8 + $0x8] sm:$0xf] }
  0xed   :  { %963 = vmatpush1.bf16.msra.mxu0 %v3061_v26  ;;  %1007 = vmatprep.subr.bf16.mxu1 %v3066_v27  ;;  %v277_v26 = vrot.slane %v231_v25, %v244_v45  ;;  %v281_v27 = vrot.slane %v231_v25, %v248_v46 }
  0xee   :  { %964 = vmatprep.subr.bf16.mxu0 %v3069_v28  ;;  %v269_v28 = vrot.slane %v231_v25, %v3584_v58 }
  0xf0   :  { %1008 = vmatpush1.bf16.msra.mxu1 %v3064_v29  ;;  %v273_v29 = vrot.slane %v231_v25, %v3560_v38 }
  0xf1   :  { %965 = vmatpush1.bf16.msra.mxu0 %v3067_v30  ;;  %1009 = vmatprep.subr.bf16.mxu1 %v3072_v31 }
  0xf2   :  { %966 = vmatprep.subr.bf16.mxu0 %v3075_v32 }
  0xf4   :  { %1010 = vmatpush1.bf16.msra.mxu1 %v3070_v33 }
  0xf5   :  { %967 = vmatpush1.bf16.msra.mxu0 %v3073_v34  ;;  %2797 = vmatprep.subr.bf16.mxu1 %v3381_v35 }
  0xf6   :  { %2821 = vmatprep.subr.bf16.mxu0 %v3381_v35 }
  0xf7   :  { %1028 = vmatmul.mubr.bf16.vlgmr.msra.gmra.mrb[8].mxu1 %v3538_v23 }
  0xf8   :  { %985 = vmatmul.mubr.bf16.vlgmr.msra.gmra.mrb[8].mxu0 %v3538_v23  ;;  %2799 = vmatprep.mubr.msk.bf16.mxu1 %vm3382_vm0, %v3381_v35  ;;  %v230_v23 = vld [vmem:[#allocation8] sm:$0xff] }
  0xf9   :  { %2823 = vmatprep.mubr.msk.bf16.mxu0 %vm3382_vm0, %v3381_v35  ;;  %v241_v41 = vrot.slane %v230_v23, %v3560_v38  ;;  %v3567_v47 = vrot.slane %v230_v23, %v244_v45  ;;  %v3571_v49 = vrot.slane %v230_v23, %v248_v46  ;;  %v253_v57 = vrot.slane %v230_v23, %v252_v51 }
  0xfa   :  { %v257_v59 = vrot.slane %v230_v23, %v256_v53  ;;  %v237_v63 = vrot.slane %v230_v23, %v3584_v58  ;;  %v3600_v16 = vrot.slane %v230_v23, %v260_v15  ;;  %v3604_v18 = vrot.slane %v230_v23, %v264_v0 }
 0x189   :  { %v814_v39 = vpop.f32.mrb[0].mxu0  ;;  %v3569_v48 = vpop.f32.mrb[0].mxu1 }
 0x18a   :  { %v816_v40 = vpop.f32.mrb[1].mxu0  ;;  %v3573_v50 = vpop.f32.mrb[1].mxu1  ;;  %v815_v7 = vadd.f32 %v814_v39, %v237_v63 }
 0x18b   :  { %v818_v42 = vpop.f32.mrb[2].mxu0  ;;  %v861_v52 = vpop.f32.mrb[2].mxu1  ;;  %v817_v8 = vadd.f32 %v816_v40, %v241_v41 }
 0x18c   :  { %v820_v43 = vpop.f32.mrb[3].mxu0  ;;  %v3578_v54 = vadd.f32 %v861_v52, %v3567_v47  ;;  %v863_v55 = vpop.f32.mrb[3].mxu1  ;;  %v2688_v10 = vpack.c.bf16 %v815_v7, %v815_v7  ;;  %v819_v13 = vadd.f32 %v818_v42, %v237_v63 }
 0x18d   :  { %v3563_v44 = vadd.f32 %v820_v43, %v241_v41  ;;  %v3581_v56 = vadd.f32 %v863_v55, %v3571_v49  ;;  %v2694_v11 = vpack.c.bf16 %v817_v8, %v817_v8 }
 0x18e   :  { %v2689_v14 = vpack.c.bf16 %v819_v13, %v819_v13 }
 0x1a9   :  { %v900_v60 = vpop.f32.mrb[4].mxu0 }
 0x1aa   :  { %v901_v61 = vadd.f32 %v900_v60, %v253_v57  ;;  %v902_v62 = vpop.f32.mrb[5].mxu0  ;;  %v3602_v17 = vpop.f32.mrb[4].mxu1 }
 0x1ab   :  { %v903_v1 = vadd.f32 %v902_v62, %v257_v59  ;;  %v904_v2 = vpop.f32.mrb[6].mxu0  ;;  %v3606_v19 = vpop.f32.mrb[5].mxu1 }
 0x1ac   :  { %v2690_v3 = vpack.c.bf16 %v901_v61, %v901_v61  ;;  %v906_v4 = vpop.f32.mrb[7].mxu0  ;;  %v905_v9 = vadd.f32 %v904_v2, %v253_v57  ;;  %v947_v20 = vpop.f32.mrb[6].mxu1 }
 0x1ad   :  { %v2696_v5 = vpack.c.bf16 %v903_v1, %v903_v1  ;;  %v3587_v6 = vadd.f32 %v906_v4, %v257_v59  ;;  %v3609_v21 = vadd.f32 %v947_v20, %v3600_v16  ;;  %v949_v22 = vpop.f32.mrb[7].mxu1 }
 0x1ae   :  { %2798 = vmatpush3.bf16.xpose.msra.mxu1 %v2690_v3  ;;  %v2691_v12 = vpack.c.bf16 %v905_v9, %v905_v9  ;;  %v3612_v24 = vadd.f32 %v949_v22, %v3604_v18 }
 0x1af   :  { %2822 = vmatpush3.bf16.xpose.msra.mxu0 %v2696_v5  ;;  %2803 = vmatprep.subr.bf16.mxu1 %v3381_v35 }
 0x1b0   :  { %2833 = vmatprep.subr.bf16.mxu0 %v3381_v35 }
 0x1b5   :  { %2800 = vmatmul.mubr.bf16.vlgmr.msra.gmra.mrb[12].mxu1 %v2688_v10 }
 0x1b6   :  { %2804 = vmatpush3.bf16.xpose.msra.mxu1 %v2691_v12  ;;  %2824 = vmatmul.mubr.bf16.vlgmr.msra.gmra.mrb[12].mxu0 %v2694_v11 }
 0x1b7   :  { %2805 = vmatprep.mubr.msk.bf16.mxu1 %vm3382_vm0, %v3381_v35  ;;  %2809 = vmatprep.subr.bf16.mxu1 %v3381_v35 }
 0x1b8   :  { %2835 = vmatprep.mubr.msk.bf16.mxu0 %vm3382_vm0, %v3381_v35 }
 0x1bd   :  { %2806 = vmatmul.mubr.bf16.vlgmr.msra.gmra.mrb[16].mxu1 %v2689_v14 }
 0x1be   :  { %2811 = vmatprep.mubr.msk.bf16.mxu1 %vm3382_vm0, %v3381_v35 }
 0x1ca   :  { %v1029_v30 = vpop.f32.mrb[8].mxu1 }
 0x1cb   :  { %v1030_v31 = vadd.f32 %v1029_v30, %v277_v26  ;;  %v1031_v32 = vpop.f32.mrb[9].mxu1  ;;  %v986_v33 = vpop.f32.mrb[8].mxu0 }
 0x1cc   :  { %v1032_v34 = vadd.f32 %v1031_v32, %v281_v27  ;;  %v1033_v23 = vpop.f32.mrb[10].mxu1  ;;  %v987_v39 = vadd.f32 %v986_v33, %v269_v28  ;;  %v988_v40 = vpop.f32.mrb[9].mxu0 }
 0x1cd   :  { %v2704_v41 = vpack.c.bf16 %v1030_v31, %v1030_v31  ;;  %v1034_v42 = vadd.f32 %v1033_v23, %v277_v26  ;;  %v1035_v43 = vpop.f32.mrb[11].mxu1  ;;  %v989_v51 = vadd.f32 %v988_v40, %v273_v29  ;;  %v990_v52 = vpop.f32.mrb[10].mxu0 }
 0x1ce   :  { %v2710_v45 = vpack.c.bf16 %v1032_v34, %v1032_v34  ;;  %v1036_v46 = vadd.f32 %v1035_v43, %v281_v27  ;;  %v2692_v53 = vpack.c.bf16 %v987_v39, %v987_v39  ;;  %v991_v55 = vadd.f32 %v990_v52, %v269_v28  ;;  %v992_v57 = vpop.f32.mrb[11].mxu0 }
 0x1cf   :  { %v3617_v59 = vsel %vm1177_vm1, %v2704_v41, 0  ;;  %v2705_v60 = vpack.c.bf16 %v1034_v42, %v1034_v42  ;;  %v2698_v61 = vpack.c.bf16 %v989_v51, %v989_v51  ;;  %v993_v62 = vadd.f32 %v992_v57, %v273_v29 }
 0x1d0   :  { %v3620_v63 = vsel %vm1177_vm1, %v2710_v45, 0  ;;  %v2711_v1 = vpack.c.bf16 %v1036_v46, %v1036_v46  ;;  %v1179_v2 = vsel %vm1177_vm1, %v2692_v53, 0  ;;  %v2693_v3 = vpack.c.bf16 %v991_v55, %v991_v55 }
 0x1d1   :  { %v3624_v4 = vsel %vm1177_vm1, %v2705_v60, 0  ;;  %v1396_v5 = vsel %vm1177_vm1, %v2698_v61, 0  ;;  %v2699_v7 = vpack.c.bf16 %v993_v62, %v993_v62  ;;  %2810 = vmatpush3.bf16.msra.mxu1 %v1179_v2 }
 0x1d2   :  { %v3628_v8 = vsel %vm1177_vm1, %v2711_v1, 0  ;;  %v1225_v9 = vsel %vm1177_vm1, %v2693_v3, 0  ;;  %2834 = vmatpush3.bf16.msra.mxu0 %v1396_v5  ;;  %2815 = vmatprep.subr.bf16.mxu1 %v3381_v35 }
 0x1d3   :  { %v3633_v10 = vsel %vm1177_vm1, %v2699_v7, 0  ;;  %2845 = vmatprep.subr.bf16.mxu0 %v3381_v35 }
 0x288   :  { %v1103_v11 = vpop.f32.mrb[12].mxu1 }
 0x289   :  { %v2801_v12 = vpop.f32.mrb[13].mxu1  ;;  %v1322_v13 = vpop.f32.mrb[12].mxu0  ;;  %v1150_v14 = vsel %vm1149_vm2, %v1103_v11, -inf }
 0x28a   :  { %v2825_v15 = vpop.f32.mrb[13].mxu0  ;;  %1151 = vmax.xlane.f32.xlu0 %v1150_v14  ;;  %v1106_v0 = vpop.f32.mrb[14].mxu1  ;;  %v1368_v31 = vsel %vm1149_vm2, %v1322_v13, -inf  ;;  %v944_v12 = vadd.f32 %v3602_v17, %v3600_v16  ;;  %v2695_v16 = vpack.c.bf16 %v3563_v44, %v3563_v44 }
 0x28b   :  { %v2802_v20 = vpop.f32.mrb[15].mxu1  ;;  %v1325_v22 = vpop.f32.mrb[14].mxu0 }
 0x28c   :  { %v2826_v25 = vpop.f32.mrb[15].mxu0  ;;  %v2702_v15 = vpack.c.bf16 %v944_v12, %v944_v12  ;;  %v2703_v12 = vpack.c.bf16 %v3609_v21, %v3609_v21 }
 0x290   :  { %v1143_v26 = vpop.f32.mrb[16].mxu1 }
 0x291   :  { %v2807_v27 = vpop.f32.mrb[17].mxu1  ;;  %v1153_v28 = vsel %vm1149_vm2, %v1143_v26, -inf }
 0x292   :  { %1154 = vmax.xlane.f32.xlu0 %v1153_v28  ;;  %v1146_v29 = vpop.f32.mrb[18].mxu1 }
 0x293   :  { %v2808_v30 = vpop.f32.mrb[19].mxu1 }
 0x296   :  { %1369 = vmax.xlane.f32.xlu0 %v1368_v31 }
 0x317   :  { %v1152_v32 = vpop.xlane.xlu0 %1151 }
 0x318   :  { %v1156_v33 = vsub.f32 %v1103_v11, %v1152_v32 }
 0x31a   :  { %v1158_v34 = vmul.f32 1.442695, %v1156_v33 }
 0x31c   :  { %3116 = vpow2.f32 %v1158_v34 }
 0x31f   :  { %v1155_v23 = vpop.xlane.xlu0 %1154 }
 0x320   :  { %v1157_v39 = vsub.f32 %v1143_v26, %v1155_v23 }
 0x322   :  { %v1160_v40 = vmul.f32 1.442695, %v1157_v39 }
 0x323   :  { %v1370_v41 = vpop.xlane.xlu0 %1369 }
 0x324   :  { %3118 = vpow2.f32 %v1160_v40  ;;  %v1374_v42 = vsub.f32 %v1322_v13, %v1370_v41  ;;  %v2697_v13 = vpack.c.bf16 %v3587_v6, %v3587_v6  ;;  %v858_v6 = vadd.f32 %v3569_v48, %v3567_v47 }
 0x326   :  { %v3117_v43 = vpop.eup %3116  ;;  %v1376_v51 = vmul.f32 1.442695, %v1374_v42  ;;  %v2700_v17 = vpack.c.bf16 %v858_v6, %v858_v6 }
 0x327   :  { %v1162_v52 = vsel %vm1149_vm2, %v3117_v43, 0.0 }
 0x328   :  { %3120 = vpow2.f32 %v1376_v51  ;;  %1163 = vadd.xlane.f32.xlu1 %v1162_v52 }
 0x32e   :  { %v3119_v45 = vpop.eup %3118 }
 0x32f   :  { %v1165_v46 = vsel %vm1149_vm2, %v3119_v45, 0.0 }
 0x330   :  { %1166 = vadd.xlane.f32.xlu1 %v1165_v46 }
 0x332   :  { %v3121_v53 = vpop.eup %3120 }
 0x333   :  { %v1380_v55 = vsel %vm1149_vm2, %v3121_v53, 0.0 }
 0x334   :  { %1381 = vadd.xlane.f32.xlu0 %v1380_v55 }
 0x3b5   :  { %v1164_v57 = vpop.xlane.xlu1 %1163 }
 0x3b6   :  { %3122 = vrcp.f32 %v1164_v57 }
 0x3bd   :  { %v1167_v60 = vpop.xlane.xlu1 %1166 }
 0x3be   :  { %3124 = vrcp.f32 %v1167_v60 }
 0x3c0   :  { %v3123_v61 = vpop.eup %3122 }
 0x3c1   :  { %v1170_v62 = vmul.f32 %v3123_v61, %v3117_v43  ;;  %v1382_v1 = vpop.xlane.xlu0 %1381 }
 0x3c2   :  { %3126 = vrcp.f32 %v1382_v1 }
 0x3c3   :  { %v1172_v2 = vpack.c.bf16 %v1170_v62, %v1170_v62 }
 0x3c5   :  { %2812 = vmatmul.mubr.msk.bf16.vlgmr.msra.gmra.mrb[20].mxu1 %vm1149_vm2, %v1172_v2 }
 0x3c6   :  { %2816 = vmatpush3.bf16.msra.mxu1 %v1225_v9  ;;  %2817 = vmatprep.mubr.msk.bf16.mxu1 %vm3382_vm0, %v3381_v35 }
 0x3c7   :  { %2827 = vmatprep.subr.bf16.mxu1 %v3381_v35 }
 0x3c8   :  { %v3125_v3 = vpop.eup %3124 }
 0x3c9   :  { %v1171_v5 = vmul.f32 %v3125_v3, %v3119_v45 }
 0x3cb   :  { %v1173_v7 = vpack.c.bf16 %v1171_v5, %v1171_v5 }
 0x3cc   :  { %v3127_v11 = vpop.eup %3126 }
 0x3cd   :  { %v1388_v14 = vmul.f32 %v3127_v11, %v3121_v53  ;;  %2818 = vmatmul.mubr.msk.bf16.vlgmr.msra.gmra.mrb[24].mxu1 %vm1149_vm2, %v1173_v7  ;;  %v946_v7 = vadd.f32 %v3606_v19, %v3604_v18  ;;  %v860_v18 = vadd.f32 %v3573_v50, %v3571_v49  ;;  %v2701_v19 = vpack.c.bf16 %v3578_v54, %v3578_v54 }
 0x3ce   :  { %2829 = vmatprep.mubr.msk.bf16.mxu1 %vm3382_vm0, %v3381_v35 }
 0x3cf   :  { %2828 = vmatpush3.bf16.xpose.msra.mxu1 %v2697_v13  ;;  %v1390_v9 = vpack.c.bf16 %v1388_v14, %v1388_v14  ;;  %v2706_v21 = vpack.c.bf16 %v860_v18, %v860_v18  ;;  %v3089_v18 = vld [vmem:[#allocation9 + $0x30] sm:$0xff]  }
 0x3d0   :  { %2839 = vmatprep.subr.bf16.mxu1 %v3381_v35 }
 0x3d1   :  { %2836 = vmatmul.mubr.msk.bf16.vlgmr.msra.gmra.mrb[16].mxu0 %vm1149_vm2, %v1390_v9  ;;  %v2708_v9 = vpack.c.bf16 %v946_v7, %v946_v7  ;;  %v3082_v7 = vld [vmem:[#allocation9 + $0x58] sm:$0xff]  }
 0x3d2   :  { %2846 = vmatpush3.bf16.xpose.msra.mxu0 %v2702_v15  ;;  %2847 = vmatprep.mubr.msk.bf16.mxu0 %vm3382_vm0, %v3381_v35 }
 0x3d3   :  { %2857 = vmatprep.subr.bf16.mxu0 %v3381_v35 }
 0x3d6   :  { %2830 = vmatmul.mubr.bf16.vlgmr.msra.gmra.mrb[28].mxu1 %v2695_v16 }
 0x3d7   :  { %2840 = vmatpush3.bf16.msra.mxu1 %v3633_v10  ;;  %2841 = vmatprep.mubr.msk.bf16.mxu1 %vm3382_vm0, %v3381_v35 }
 0x3d8   :  { %2851 = vmatprep.subr.bf16.mxu1 %v3381_v35 }
 0x3d9   :  { %2848 = vmatmul.mubr.bf16.vlgmr.msra.gmra.mrb[20].mxu0 %v2700_v17 }
 0x3da   :  { %2858 = vmatpush3.bf16.msra.mxu0 %v3617_v59  ;;  %2859 = vmatprep.mubr.msk.bf16.mxu0 %vm3382_vm0, %v3381_v35 }
 0x3db   :  { %2869 = vmatprep.subr.bf16.mxu0 %v3381_v35 }
 0x498   :  { %v3670_v47 = vpop.f32.mrb[20].mxu1 }
 0x499   :  { %v2813_v44 = vpop.f32.mrb[21].mxu1 }
 0x49a   :  { %v1218_v48 = vpop.f32.mrb[22].mxu1 }
 0x49b   :  { %v2814_v0 = vpop.f32.mrb[23].mxu1 }
 0x4a0   :  { %v3672_v20 = vpop.f32.mrb[24].mxu1 }
 0x4a1   :  { %v1267_v10 = vpack.c.bf16 %v3672_v20, %v3670_v47  ;;  %v2819_v22 = vpop.f32.mrb[25].mxu1 }
 0x4a2   :  { %v1264_v25 = vpop.f32.mrb[26].mxu1 }
 0x4a3   :  { %v2820_v26 = vpop.f32.mrb[27].mxu1 }
 0x4a4   :  { %v3676_v27 = vpop.f32.mrb[16].mxu0 }
 0x4a5   :  { %v2837_v59 = vpop.f32.mrb[17].mxu0 }
 0x4a6   :  { %v1435_v28 = vpop.f32.mrb[18].mxu0 }
 0x4a7   :  { %v2838_v29 = vpop.f32.mrb[19].mxu0 }
 0x4a9   :  { %v1362_v30 = vpop.f32.mrb[28].mxu1 }
 0x4aa   :  { %v2831_v31 = vpop.f32.mrb[29].mxu1  ;;  %v1371_v32 = vsel %vm1149_vm2, %v1362_v30, -inf }
 0x4ab   :  { %1372 = vmax.xlane.f32.xlu1 %v1371_v32  ;;  %v1365_v33 = vpop.f32.mrb[30].mxu1 }
 0x4ac   :  { %v2832_v34 = vpop.f32.mrb[31].mxu1  ;;  %v1539_v23 = vpop.f32.mrb[20].mxu0 }
 0x4ad   :  { %v2849_v39 = vpop.f32.mrb[21].mxu0  ;;  %v1585_v40 = vsel %vm1149_vm2, %v1539_v23, -inf }
 0x4ae   :  { %1586 = vmax.xlane.f32.xlu0 %v1585_v40  ;;  %v1542_v41 = vpop.f32.mrb[22].mxu0 }
 0x4af   :  { %v2850_v42 = vpop.f32.mrb[23].mxu0 }
 0x538   :  { %v1373_v43 = vpop.xlane.xlu1 %1372 }
 0x539   :  { %v1375_v51 = vsub.f32 %v1362_v30, %v1373_v43  ;;  %v3076_v43 = vld [vmem:[#allocation9 + $0x40] sm:$0xff]  }
 0x53b   :  { %v1378_v52 = vmul.f32 1.442695, %v1375_v51  ;;  %v1587_v45 = vpop.xlane.xlu0 %1586 }
 0x53c   :  { %v1591_v46 = vsub.f32 %v1539_v23, %v1587_v45 }
 0x53d   :  { %3128 = vpow2.f32 %v1378_v52 }
 0x53e   :  { %v1593_v53 = vmul.f32 1.442695, %v1591_v46 }
 0x540   :  { %3130 = vpow2.f32 %v1593_v53 }
 0x547   :  { %v3129_v55 = vpop.eup %3128 }
 0x548   :  { %v1383_v57 = vsel %vm1149_vm2, %v3129_v55, 0.0 }
 0x549   :  { %1384 = vadd.xlane.f32.xlu1 %v1383_v57  ;;  %v2709_v57 = vpack.c.bf16 %v3612_v24, %v3612_v24  ;;  %v2707_v24 = vpack.c.bf16 %v3581_v56, %v3581_v56  ;;  %v3087_v56 = vld [vmem:[#allocation9 + $0x28] sm:$0xff]  }
 0x54a   :  { %v3131_v60 = vpop.eup %3130 }
 0x54b   :  { %v1597_v61 = vsel %vm1149_vm2, %v3131_v60, 0.0 }
 0x54c   :  { %1598 = vadd.xlane.f32.xlu0 %v1597_v61  ;;  %v3077_v61 = vld [vmem:[#allocation9] sm:$0xff]  }
 0x5d6   :  { %v1385_v62 = vpop.xlane.xlu1 %1384 }
 0x5d7   :  { %3132 = vrcp.f32 %v1385_v62 }
 0x5d9   :  { %v1599_v1 = vpop.xlane.xlu0 %1598 }
 0x5da   :  { %3134 = vrcp.f32 %v1599_v1  ;;  %v3078_v1 = vld [vmem:[#allocation9 + $0x48] sm:$0xff]  }
 0x5e1   :  { %v3133_v2 = vpop.eup %3132 }
 0x5e2   :  { %v1389_v3 = vmul.f32 %v3133_v2, %v3129_v55  ;;  %v3079_v2 = vld [vmem:[#allocation9 + $0x8] sm:$0xff]  }
 0x5e4   :  { %v3135_v5 = vpop.eup %3134  ;;  %v1391_v11 = vpack.c.bf16 %v1389_v3, %v1389_v3  ;;  %v3080_v3 = vld [vmem:[#allocation9 + $0x50] sm:$0xff]  }
 0x5e5   :  { %v1605_v13 = vmul.f32 %v3135_v5, %v3131_v60  ;;  %v3081_v5 = vld [vmem:[#allocation9 + $0x10] sm:$0xff]  }
 0x5e6   :  { %2842 = vmatmul.mubr.msk.bf16.vlgmr.msra.gmra.mrb[32].mxu1 %vm1149_vm2, %v1391_v11  ;;  %v3083_v11 = vld [vmem:[#allocation9 + $0x18] sm:$0xff]  }
 0x5e7   :  { %2852 = vmatpush3.bf16.xpose.msra.mxu1 %v2703_v12  ;;  %v1607_v14 = vpack.c.bf16 %v1605_v13, %v1605_v13  ;;  %2853 = vmatprep.mubr.msk.bf16.mxu1 %vm3382_vm0, %v3381_v35  ;;  %v3084_v12 = vld [vmem:[#allocation9 + $0x60] sm:$0xff]  }
 0x5e8   :  { %2863 = vmatprep.subr.bf16.mxu1 %v3381_v35  ;;  %v3085_v13 = vld [vmem:[#allocation9 + $0x20] sm:$0xff]  }
 0x5e9   :  { %2860 = vmatmul.mubr.msk.bf16.vlgmr.msra.gmra.mrb[24].mxu0 %vm1149_vm2, %v1607_v14  ;;  %v3086_v14 = vld [vmem:[#allocation9 + $0x68] sm:$0xff]  }
 0x5ea   :  { %2870 = vmatpush3.bf16.xpose.msra.mxu0 %v2708_v9  ;;  %2871 = vmatprep.mubr.msk.bf16.mxu0 %vm3382_vm0, %v3381_v35  ;;  %v3088_v9 = vld [vmem:[#allocation9 + $0x70] sm:$0xff]  }
 0x5eb   :  { %2881 = vmatprep.subr.bf16.mxu0 %v3381_v35 }
 0x5ee   :  { %2854 = vmatmul.mubr.bf16.vlgmr.msra.gmra.mrb[36].mxu1 %v2701_v19  ;;  %v3091_v19 = vld [vmem:[#allocation9 + $0x38] sm:$0xff]  }
 0x5ef   :  { %2864 = vmatpush3.bf16.msra.mxu1 %v3624_v4  ;;  %2865 = vmatprep.mubr.msk.bf16.mxu1 %vm3382_vm0, %v3381_v35 }
 0x5f0   :  { %2875 = vmatprep.subr.bf16.mxu1 %v3381_v35 }
 0x5f1   :  { %2872 = vmatmul.mubr.bf16.vlgmr.msra.gmra.mrb[28].mxu0 %v2706_v21 }
 0x5f2   :  { %2882 = vmatpush3.bf16.msra.mxu0 %v3620_v63  ;;  %2883 = vmatprep.mubr.msk.bf16.mxu0 %vm3382_vm0, %v3381_v35 }
 0x5f3   :  { %2744 = vmatprep.subr.bf16.mxu0 %v3076_v43  ;;  %v3095_v43 = vld [vmem:[#allocation9 + $0x88] sm:$0xff]  }
 0x6b9   :  { %v1478_v49 = vpop.f32.mrb[32].mxu1 }
 0x6ba   :  { %v1484_v50 = vpack.c.bf16 %v1478_v49, %v3676_v27  ;;  %v2843_v15 = vpop.f32.mrb[33].mxu1 }
 0x6bb   :  { %v1481_v54 = vpop.f32.mrb[34].mxu1 }
 0x6bc   :  { %v2844_v6 = vpop.f32.mrb[35].mxu1  ;;  %v3706_v16 = vpop.f32.mrb[24].mxu0 }
 0x6bd   :  { %v2861_v4 = vpop.f32.mrb[25].mxu0 }
 0x6be   :  { %v1652_v17 = vpop.f32.mrb[26].mxu0 }
 0x6bf   :  { %v2862_v44 = vpop.f32.mrb[27].mxu0 }
 0x6c1   :  { %v1579_v48 = vpop.f32.mrb[36].mxu1 }
 0x6c2   :  { %v2855_v0 = vpop.f32.mrb[37].mxu1  ;;  %v1588_v22 = vsel %vm1149_vm2, %v1579_v48, -inf }
 0x6c3   :  { %1589 = vmax.xlane.f32.xlu1 %v1588_v22  ;;  %v1582_v63 = vpop.f32.mrb[38].mxu1 }
 0x6c4   :  { %v2856_v25 = vpop.f32.mrb[39].mxu1  ;;  %v1756_v26 = vpop.f32.mrb[28].mxu0 }
 0x6c5   :  { %v2873_v59 = vpop.f32.mrb[29].mxu0  ;;  %v1802_v28 = vsel %vm1149_vm2, %v1756_v26, -inf }
 0x6c6   :  { %1803 = vmax.xlane.f32.xlu0 %v1802_v28  ;;  %v1759_v27 = vpop.f32.mrb[30].mxu0 }
 0x6c7   :  { %v2874_v29 = vpop.f32.mrb[31].mxu0 }
 0x750   :  { %v1590_v30 = vpop.xlane.xlu1 %1589 }
 0x751   :  { %v1592_v31 = vsub.f32 %v1579_v48, %v1590_v30 }
 0x753   :  { %v1595_v32 = vmul.f32 1.442695, %v1592_v31  ;;  %v1804_v33 = vpop.xlane.xlu0 %1803 }
 0x754   :  { %v1808_v34 = vsub.f32 %v1756_v26, %v1804_v33  ;;  %v3092_v33 = vld [vmem:[#allocation9 + $0xc0] sm:$0xff]  }
 0x755   :  { %3136 = vpow2.f32 %v1595_v32 }
 0x756   :  { %v1810_v23 = vmul.f32 1.442695, %v1808_v34 }
 0x758   :  { %3138 = vpow2.f32 %v1810_v23 }
 0x75f   :  { %v3137_v39 = vpop.eup %3136 }
 0x760   :  { %v1600_v40 = vsel %vm1149_vm2, %v3137_v39, 0.0 }
 0x761   :  { %1601 = vadd.xlane.f32.xlu1 %v1600_v40  ;;  %v3093_v40 = vld [vmem:[#allocation9 + $0x80] sm:$0xff]  }
 0x762   :  { %v3139_v41 = vpop.eup %3138 }
 0x763   :  { %v1814_v42 = vsel %vm1149_vm2, %v3139_v41, 0.0 }
 0x764   :  { %1815 = vadd.xlane.f32.xlu0 %v1814_v42  ;;  %v3094_v42 = vld [vmem:[#allocation9 + $0xc8] sm:$0xff]  }
 0x7ee   :  { %v1602_v51 = vpop.xlane.xlu1 %1601 }
 0x7ef   :  { %3140 = vrcp.f32 %v1602_v51  ;;  %v3096_v51 = vld [vmem:[#allocation9 + $0xd0] sm:$0xff]  }
 0x7f1   :  { %v1816_v52 = vpop.xlane.xlu0 %1815 }
 0x7f2   :  { %3142 = vrcp.f32 %v1816_v52  ;;  %v3097_v52 = vld [vmem:[#allocation9 + $0x90] sm:$0xff]  }
 0x7f9   :  { %v3141_v45 = vpop.eup %3140 }
 0x7fa   :  { %v1606_v46 = vmul.f32 %v3141_v45, %v3137_v39  ;;  %v3098_v45 = vld [vmem:[#allocation9 + $0xd8] sm:$0xff]  }
 0x7fc   :  { %v3143_v53 = vpop.eup %3142  ;;  %v1608_v55 = vpack.c.bf16 %v1606_v46, %v1606_v46  ;;  %v3099_v46 = vld [vmem:[#allocation9 + $0x98] sm:$0xff]  }
 0x7fd   :  { %v1822_v60 = vmul.f32 %v3143_v53, %v3139_v41  ;;  %v3100_v53 = vld [vmem:[#allocation9 + $0xe0] sm:$0xff]  }
 0x7fe   :  { %2866 = vmatmul.mubr.msk.bf16.vlgmr.msra.gmra.mrb[40].mxu1 %vm1149_vm2, %v1608_v55  ;;  %v3101_v55 = vld [vmem:[#allocation9 + $0xa0] sm:$0xff]  }
 0x7ff   :  { %2876 = vmatpush3.bf16.xpose.msra.mxu1 %v2709_v57  ;;  %v1824_v62 = vpack.c.bf16 %v1822_v60, %v1822_v60  ;;  %2877 = vmatprep.mubr.msk.bf16.mxu1 %vm3382_vm0, %v3381_v35  ;;  %v3102_v57 = vld [vmem:[#allocation9 + $0xe8] sm:$0xff]  }
 0x800   :  { %2887 = vmatprep.subr.bf16.mxu1 %v3381_v35  ;;  %v3103_v60 = vld [vmem:[#allocation9 + $0xa8] sm:$0xff]  }
 0x801   :  { %2884 = vmatmul.mubr.msk.bf16.vlgmr.msra.gmra.mrb[32].mxu0 %vm1149_vm2, %v1824_v62  ;;  %v3105_v62 = vld [vmem:[#allocation9 + $0xb0] sm:$0xff]  }
 0x802   :  { %2745 = vmatpush3.bf16.msra.mxu0 %v3077_v61  ;;  %2219 = vmatprep.mubr.bf16.mxu0 %v1484_v50  ;;  %v3104_v61 = vld [vmem:[#allocation9 + $0xf0] sm:$0xff]  }
 0x803   :  { %2746 = vmatprep.subr.bf16.mxu0 %v3078_v1  ;;  %v3106_v1 = vld [vmem:[#allocation9 + $0xf8] sm:$0xff]  }
 0x806   :  { %2878 = vmatmul.mubr.bf16.vlgmr.msra.gmra.mrb[44].mxu1 %v2707_v24  ;;  %2747 = vmatpush3.bf16.msra.mxu0 %v3079_v2  ;;  %v3107_v2 = vld [vmem:[#allocation9 + $0xb8] sm:$0xff]   ;;  %v3109_v24 = vld [vmem:[#allocation12 + $0x8] sm:$0xff]  }
 0x807   :  { %2888 = vmatpush3.bf16.msra.mxu1 %v3628_v8  ;;  %2748 = vmatprep.subr.bf16.mxu0 %v3080_v3  ;;  %v3090_v8 = vld [vmem:[#allocation9 + $0x78] sm:$0xff]   ;;  %v3108_v3 = vld [vmem:[#allocation12] sm:$0xff]  }
 0x808   :  { %2889 = vmatprep.mubr.msk.bf16.mxu1 %vm3382_vm0, %v3381_v35  ;;  %2766 = vmatprep.subr.bf16.mxu1 %v3092_v33 }
 0x80a   :  { %2749 = vmatpush3.bf16.msra.mxu0 %v3081_v5  ;;  %v3110_v5 = vld [vmem:[#allocation12 + $0x10] sm:$0xff]  }
 0x80b   :  { %2750 = vmatprep.subr.bf16.mxu0 %v3082_v7  ;;  %v3111_v7 = vld [vmem:[#allocation12 + $0x18] sm:$0xff]  }
 0x80e   :  { %2751 = vmatpush3.bf16.msra.mxu0 %v3083_v11  ;;  %v3112_v11 = vld [vmem:[#allocation12 + $0x20] sm:$0xff]  }
 0x80f   :  { %2752 = vmatprep.subr.bf16.mxu0 %v3084_v12  ;;  %v3113_v12 = vld [vmem:[#allocation12 + $0x28] sm:$0xff]  }
 0x812   :  { %2753 = vmatpush3.bf16.msra.mxu0 %v3085_v13 }
 0x813   :  { %2754 = vmatprep.subr.bf16.mxu0 %v3086_v14 }
 0x816   :  { %2755 = vmatpush3.bf16.msra.mxu0 %v3087_v56 }
 0x817   :  { %2756 = vmatprep.subr.bf16.mxu0 %v3088_v9 }
 0x81a   :  { %2757 = vmatpush3.bf16.msra.mxu0 %v3089_v18 }
 0x81b   :  { %2758 = vmatprep.subr.bf16.mxu0 %v3090_v8  ;;  %v3114_v8 = vld [vmem:[#allocation12 + $0x30] sm:$0xff]  }
 0x81e   :  { %2759 = vmatpush3.bf16.msra.mxu0 %v3091_v19  ;;  %v3115_v19 = vld [vmem:[#allocation12 + $0x38] sm:$0xff]  }
 0x81f   :  { %2893 = vmatprep.subr.bf16.mxu0 %v3381_v35 }
 0x821   :  { %2220 = vmatmul.mubr.bf16.vlgmr.msra.gmra.mrb[36].mxu0 %v1267_v10 }
 0x822   :  { %2909 = vmatprep.mubr.msk.bf16.mxu0 %vm3382_vm0, %v3381_v35  ;;  %2894 = vmatpush3.bf16.msra.mxu0 %v3108_v3 }
 0x823   :  { %2895 = vmatprep.subr.bf16.mxu0 %v3381_v35 }
 0x826   :  { %2896 = vmatpush3.bf16.msra.mxu0 %v3109_v24 }
 0x827   :  { %2897 = vmatprep.subr.bf16.mxu0 %v3381_v35 }
 0x82a   :  { %2898 = vmatpush3.bf16.msra.mxu0 %v3110_v5 }
 0x82b   :  { %2899 = vmatprep.subr.bf16.mxu0 %v3381_v35 }
 0x82e   :  { %2900 = vmatpush3.bf16.msra.mxu0 %v3111_v7 }
 0x82f   :  { %2901 = vmatprep.subr.bf16.mxu0 %v3381_v35 }
 0x832   :  { %2902 = vmatpush3.bf16.msra.mxu0 %v3112_v11 }
 0x833   :  { %2903 = vmatprep.subr.bf16.mxu0 %v3381_v35 }
 0x836   :  { %2904 = vmatpush3.bf16.msra.mxu0 %v3113_v12 }
 0x837   :  { %2905 = vmatprep.subr.bf16.mxu0 %v3381_v35 }
 0x83a   :  { %2906 = vmatpush3.bf16.msra.mxu0 %v3114_v8 }
 0x83b   :  { %2907 = vmatprep.subr.bf16.mxu0 %v3381_v35  ;;  %v2678_v35 = vld [vmem:[#allocation14] ss:$0 sm:$0xff] }
 0x83e   :  { %2908 = vmatpush3.bf16.msra.mxu0 %v3115_v19 }
 0x8d1   :  { %v3730_v21 = vpop.f32.mrb[40].mxu1 }
 0x8d2   :  { %v1701_v49 = vpack.c.bf16 %v3730_v21, %v3706_v16  ;;  %v2867_v50 = vpop.f32.mrb[41].mxu1 }
 0x8d3   :  { %v1698_v15 = vpop.f32.mrb[42].mxu1  ;;  %v2645_v50 = vld [vmem:[#allocation11] ss:$0 sm:$0xff] }
 0x8d4   :  { %v2868_v54 = vpop.f32.mrb[43].mxu1  ;;  %v3734_v6 = vpop.f32.mrb[32].mxu0 }
 0x8d5   :  { %v2885_v4 = vpop.f32.mrb[33].mxu0 }
 0x8d6   :  { %v1869_v17 = vpop.f32.mrb[34].mxu0 }
 0x8d7   :  { %v2886_v44 = vpop.f32.mrb[35].mxu0 }
 0x8d9   :  { %v1796_v48 = vpop.f32.mrb[44].mxu1 }
 0x8da   :  { %v2879_v0 = vpop.f32.mrb[45].mxu1  ;;  %v1805_v47 = vsel %vm1149_vm2, %v1796_v48, -inf }
 0x8db   :  { %1806 = vmax.xlane.f32.xlu1 %v1805_v47  ;;  %v1799_v20 = vpop.f32.mrb[46].mxu1 }
 0x8dc   :  { %v2880_v10 = vpop.f32.mrb[47].mxu1 }
 0x8f4   :  { %v2760_v22 = vpop.f32.mrb[36].mxu0 }
 0x8f5   :  { %v2761_v63 = vpop.f32.mrb[37].mxu0 }
 0x8f6   :  { %v3737_v25 = vadd.f32 %v2761_v63, %v2760_v22  ;;  %v2763_v26 = vpop.f32.mrb[38].mxu0 }
 0x8f7   :  { %v2764_v59 = vpop.f32.mrb[39].mxu0 }
 0x8f8   :  { %v3739_v28 = vadd.f32 %v2764_v59, %v2763_v26  ;;  %v2222_v4 = vadd.f32 %v3737_v25, %v2645_v50  ;;  %v2687_v26 = vld [vmem:[#allocation15] ss:$0 sm:$0xff] }
 0x968   :  { %v1807_v27 = vpop.xlane.xlu1 %1806 }
 0x969   :  { %v1809_v29 = vsub.f32 %v1796_v48, %v1807_v27  ;;  %v2225_v48 = vadd.f32 %v3739_v28, %v2645_v50 }
 0x96b   :  { %v1812_v30 = vmul.f32 1.442695, %v1809_v29 }
 0x96d   :  { %3144 = vpow2.f32 %v1812_v30  ;;  %v2400_v30 = vand.u32 127, %v234_v36 }
 0x977   :  { %v3145_v31 = vpop.eup %3144 }
 0x978   :  { %v1817_v32 = vsel %vm1149_vm2, %v3145_v31, 0.0 }
 0x979   :  { %1818 = vadd.xlane.f32.xlu1 %v1817_v32 }
 0xa06   :  { %v1819_v34 = vpop.xlane.xlu1 %1818 }
 0xa07   :  { %3146 = vrcp.f32 %v1819_v34 }
 0xa11   :  { %v3147_v23 = vpop.eup %3146 }
 0xa12   :  { %v1823_v39 = vmul.f32 %v3147_v23, %v3145_v31  ;;  %v2403_v31 = vsub.s32 %v2400_v30, %v3557_v37 }
 0xa14   :  { %v1825_v41 = vpack.c.bf16 %v1823_v39, %v1823_v39 }
 0xa16   :  { %2890 = vmatmul.mubr.msk.bf16.vlgmr.msra.gmra.mrb[48].mxu1 %vm1149_vm2, %v1825_v41 }
 0xa17   :  { %2767 = vmatpush3.bf16.msra.mxu1 %v3093_v40 }
 0xa18   :  { %2768 = vmatprep.subr.bf16.mxu1 %v3094_v42 }
 0xa1b   :  { %2769 = vmatpush3.bf16.msra.mxu1 %v3095_v43 }
 0xa1c   :  { %2770 = vmatprep.subr.bf16.mxu1 %v3096_v51 }
 0xa1f   :  { %2771 = vmatpush3.bf16.msra.mxu1 %v3097_v52 }
 0xa20   :  { %2772 = vmatprep.subr.bf16.mxu1 %v3098_v45 }
 0xa23   :  { %2773 = vmatpush3.bf16.msra.mxu1 %v3099_v46 }
 0xa24   :  { %2774 = vmatprep.subr.bf16.mxu1 %v3100_v53 }
 0xa27   :  { %2775 = vmatpush3.bf16.msra.mxu1 %v3101_v55 }
 0xa28   :  { %2776 = vmatprep.subr.bf16.mxu1 %v3102_v57 }
 0xa2b   :  { %2777 = vmatpush3.bf16.msra.mxu1 %v3103_v60 }
 0xa2c   :  { %2778 = vmatprep.subr.bf16.mxu1 %v3104_v61 }
 0xa2f   :  { %2779 = vmatpush3.bf16.msra.mxu1 %v3105_v62 }
 0xa30   :  { %2780 = vmatprep.subr.bf16.mxu1 %v3106_v1 }
 0xa33   :  { %2781 = vmatpush3.bf16.msra.mxu1 %v3107_v2 }
 0xae9   :  { %v1912_v13 = vpop.f32.mrb[48].mxu1 }
 0xaea   :  { %v1918_v14 = vpack.c.bf16 %v1912_v13, %v3734_v6  ;;  %v2891_v56 = vpop.f32.mrb[49].mxu1 }
 0xaeb   :  { %v1915_v9 = vpop.f32.mrb[50].mxu1 }
 0xaec   :  { %v2892_v18 = vpop.f32.mrb[51].mxu1  ;;  %2260 = vmatprep.mubr.bf16.mxu1 %v1918_v14 }
 0xaed   :  { %2261 = vmatmul.mubr.bf16.vlgmr.msra.gmra.mrb[52].mxu1 %v1701_v49 }
 0xbc0   :  { %v2782_v15 = vpop.f32.mrb[52].mxu1 }
 0xbc1   :  { %v2783_v54 = vpop.f32.mrb[53].mxu1 }
 0xbc2   :  { %v2784_v6 = vadd.f32 %v2783_v54, %v2782_v15  ;;  %v2785_v17 = vpop.f32.mrb[54].mxu1 }
 0xbc3   :  { %v2786_v44 = vpop.f32.mrb[55].mxu1 }
 0xbc4   :  { %v2263_v0 = vadd.f32 %v2784_v6, %v2222_v4  ;;  %v2787_v47 = vadd.f32 %v2786_v44, %v2785_v17 }
 0xbc6   :  { %v3756_v16 = vadd.f32 %v2787_v47, %v2225_v48 }
 0xbc8   :  { %v2269_v21 = vpack.c.bf16 %v3756_v16, %v2263_v0 }
 0xbca   :  { %2910 = vmatmul.mubr.bf16.vlgmr.msra.gmra.mrb[40].mxu0 %v2269_v21 }
 0xc9d   :  { %v2375_v49 = vpop.f32.mrb[40].mxu0 }
 0xc9e   :  { %v2376_v20 = vadd.f32 %v2678_v35, %v2375_v49  ;;  %v2911_v10 = vpop.f32.mrb[41].mxu0 }
 0xc9f   :  { %v2378_v22 = vpop.f32.mrb[42].mxu0 }
 0xca0   :  { %3148 = vtanh.f32 %v2376_v20  ;;  %v2379_v63 = vadd.f32 %v2678_v35, %v2378_v22  ;;  %v2912_v25 = vpop.f32.mrb[43].mxu0 }
 0xca2   :  { %3150 = vtanh.f32 %v2379_v63 }
 0xcaa   :  { %v3149_v59 = vpop.eup %3148 }
 0xcab   :  { %v2391_v27 = vmul.f32 %v3149_v59, %v2687_v26 }
 0xcac   :  { %v3151_v28 = vpop.eup %3150 }
 0xcad   :  { %2393 = vadd.xlane.f32.xlu0 %v2391_v27  ;;  %v2392_v29 = vmul.f32 %v3151_v28, %v2687_v26 }
 0xcaf   :  { %2395 = vadd.xlane.f32.xlu1 %v2392_v29 }
 0xd3a   :  { %v2394_v32 = vpop.xlane.xlu0 %2393 }
 0xd3b   :  { %v2404_v34 = vrot.slane %v2394_v32, %v2403_v31 }
 0xd3c   :  { %v2396_v33 = vpop.xlane.xlu1 %2395 }
 0xd3d   :  { %v2408_v23 = vrot.slane %v2396_v33, %v2403_v31 }
 0xd3f   :  { %v2410_v39 = vsel %vm2409_vm3, %v2408_v23, %v2404_v34 }
 0xd40   :  { %v2413_v40 = vsel %vm2412_vm4, %v2410_v39, -inf }
 0xd41   :  { %2414 = vmax.xlane.f32.xlu0 %v2413_v40 }
 0xdce   :  { %v2415_v41 = vpop.xlane.xlu0 %2414 }
 0xdcf   :  { %v2420_v42 = vrot.slane %v2415_v41, %v3584_v58  ;;  %v2424_v43 = vrot.slane %v2415_v41, %v3560_v38 }
 0xdd1   :  { %v2427_v51 = vsub.f32 %v2394_v32, %v2420_v42  ;;  %v2428_v36 = vsub.f32 %v2396_v33, %v2424_v43 }
 0xdd3   :  { %v2429_v52 = vmul.f32 1.442695, %v2427_v51  ;;  %v2431_v37 = vmul.f32 1.442695, %v2428_v36 }
 0xdd5   :  { %3152 = vpow2.f32 %v2429_v52 }
 0xdd6   :  { %3154 = vpow2.f32 %v2431_v37 }
 0xddf   :  { %v3153_v45 = vpop.eup %3152 }
 0xde0   :  { %v3155_v46 = vpop.eup %3154  ;;  %2436 = vperm.xlu1 %2929, %v3153_v45  }
 0xde1   :  { %2439 = vperm.xlu0 %2930, %v3155_v46  }
 0xe5f   :  { %v2437_v53 = vpop.permute.xlu1 %2436 }
 0xe60   :  { %v2440_v55 = vpop.permute.xlu0 %2439  ;;  %v2444_v57 = vrot.slane %v2437_v53, %v2403_v31 }
 0xe61   :  { %v2448_v60 = vrot.slane %v2440_v55, %v2403_v31 }
 0xe63   :  { %v2449_v61 = vsel %vm2409_vm3, %v2448_v60, %v2444_v57 }
 0xe64   :  { %v2451_v62 = vsel %vm2412_vm4, %v2449_v61, 0.0 }
 0xe65   :  { %2452 = vadd.xlane.f32.xlu1 %v2451_v62 }
 0xef2   :  { %v2453_v1 = vpop.xlane.xlu1 %2452 }
 0xef3   :  { %3156 = vrcp.f32 %v2453_v1 }
 0xefd   :  { %v3157_v2 = vpop.eup %3156 }
 0xefe   :  { %v2459_v3 = vrot.slane %v3157_v2, %v3584_v58  ;;  %v2463_v5 = vrot.slane %v3157_v2, %v3560_v38 }
 0xf00   :  { %v2466_v24 = vmul.f32 %v3153_v45, %v2459_v3  ;;  %v2467_v7 = vmul.f32 %v3155_v46, %v2463_v5 }
 0xf02   :  { %2470 = vperm.xlu0 %2930, %v2466_v24  }
 0xf06   :  { %2475 = vperm.xlu0 %2930, %v2467_v7  }
 0xf81   :  { %v2471_v11 = vpop.permute.xlu0 %2470 }
 0xf82   :  { %v2478_v12 = vmul.f32 %v2471_v11, %v2263_v0 }
 0xf84   :  { %v2480_v13 = vrot.slane %v2478_v12, 4 }
 0xf85   :  { %v2476_v14 = vpop.permute.xlu0 %2475 }
 0xf86   :  { %v2481_v56 = vadd.f32 %v2480_v13, %v2478_v12  ;;  %v2479_v9 = vmul.f32 %v2476_v14, %v3756_v16 }
 0xf88   :  { %v2482_v18 = vrot.slane %v2481_v56, 2  ;;  %v2486_v8 = vrot.slane %v2479_v9, 4 }
 0xf8a   :  { %v2483_v19 = vadd.f32 %v2482_v18, %v2481_v56  ;;  %v2487_v50 = vadd.f32 %v2486_v8, %v2479_v9 }
 0xf8c   :  { %v2488_v15 = vrot.slane %v2487_v50, 2  ;;  %v2484_v54 = vrot.slane %v2483_v19, 1 }
 0xf8e   :  { %v2489_v58 = vadd.f32 %v2488_v15, %v2487_v50  ;;  %v2485_v38 = vadd.f32 %v2484_v54, %v2483_v19 }
 0xf90   :  { %v2490_v4 = vrot.slane %v2489_v58, 1 }
 0xf92   :  { %v2491_v6 = vadd.f32 %v2490_v4, %v2489_v58 }
 0xf94   :  { %v2494_v17 = vsel %vm2409_vm3, %v2491_v6, %v2485_v38 }
 0xf95   :  { %2496 = vst [vmem:[#allocation17] sm:$0x3] %v2494_v17 }
 0xf96   :  { %3345 = shalt.err (!%p3342_p12)
}
 0xf97   :  { %s3346_s5 = scalar_lea.hbm %s3791_s8, 32 }
 0xf98   :  { %p3347_p13 = scmp.ne.s32.totalorder %s3791_s8, %s3346_s5  ;;  %p3350_p0 = scmp.lt.u32.totalorder %s3346_s5, %s3791_s8 }
 0xf9a   :  { %p3352_p1 = pnand %p3350_p0, %p3347_p13 }
 0xf9c   :  { %3355 = shalt.err (!%p3352_p1)
}
 0xf9d   :  { %2506 = dma.vmem_to_hbm [thread:$0]  %s2504_s10, 32, %s3791_s8, [#allocation5]  }
 0xf9e   :  { %3366 = dma.done.wait [#allocation5], 32  }
 0xf9f   :  { %3367 = vsyncadd [#allocation5], 4294967264 }
 0xfa0   :  { %2510 = vsyncpa [#allocation4], 1 }
 0xfa1   :  { %2511 = vsyncpa [#allocation7], 1 }
 0xfa2   :  { %2512 = vsyncpa [#allocation10], 1 }
 0xfa3   :  { %2513 = vsyncpa [#allocation13], 1 }
 0xfa4   :  { %2514 = vsyncpa [#allocation16], 1 }
 0xfa5   :  { %2515 = vsyncpa [#allocation5], 1 }

</bundles_post_ra>
